<compile_context>
chip_gen: v7x
topology: tpu7x:2x2x1
jax: 0.10.0
libtpu: 0.0.40
codegen_flags: <defaults>
</compile_context>

<pallas_src>
import math
import functools

import jax
import jax.numpy as jnp
import numpy as np
from jax.experimental import pallas as pl
from jax.experimental.pallas import tpu as pltpu


# ----------------------------- Pallas kernel --------------------------------- #
def _attn_kernel(x_ref, wqkv_ref, wo_ref, cos_ref, sin_ref, o_ref, *,
                 n_rep, head_dim, compute_dtype):
    """One (batch, kv-head) step; accumulates the fused output projection.

    x_ref    : (1, S, dim)              bf16 activations for batch b
    wqkv_ref : (1, dim, (n_rep+2)*Dh)   bf16 fused [q_0..q_{n_rep-1} | k | v] weights
                                        (wq columns pre-scaled by 1/sqrt(Dh))
    wo_ref   : (1, n_rep*Dh, dim)       bf16 wo^T rows for this kv-group's query heads
    cos_ref  : (S, Dh)                  f32 [cos, cos] duplicated halves
    sin_ref  : (S, Dh)                  f32 [-sin, sin] signed halves
    o_ref    : (1, S, dim)              f32 output accumulator (resident across g)
    """
    g = pl.program_id(1)

    @pl.when(g == 0)
    def _():
        o_ref[...] = jnp.zeros_like(o_ref)

    x = x_ref[0]                       # (S, dim) bf16
    w = wqkv_ref[0]                    # (dim, (n_rep+2)*Dh) bf16
    wo_g = wo_ref[0]                   # (n_rep*Dh, dim) bf16
    cos = cos_ref[...]                 # (S, Dh) f32 -- loaded once, reused by all heads
    sin = sin_ref[...]                 # (S, Dh) f32

    half = head_dim // 2

    # Fused QKV projection: single wide MXU matmul, bf16 operands, f32 accumulation.
    qkv = jnp.dot(x, w, preferred_element_type=jnp.float32)   # (S, (n_rep+2)*Dh) f32

    def rope(t):
        # rotate-half in the de-interleaved layout; roll runs on the XLU slot,
        # elementwise math stays f32 (v5e VPU/EUP have no bf16).
        return t * cos + pltpu.roll(t, shift=half, axis=1) * sin

    k = qkv[:, n_rep * head_dim:(n_rep + 1) * head_dim]       # (S, Dh)
    v = qkv[:, (n_rep + 1) * head_dim:(n_rep + 2) * head_dim]
    # K is RoPE'd + transposed ONCE per kv-head and reused by all n_rep query heads.
    krT = rope(k).T.astype(compute_dtype)                     # (Dh, S)
    vc = v.astype(compute_dtype)                              # (S, Dh)

    heads = []
    # TODO(synk): for large n_rep (Llama-3 GQA) use lax.fori_loop(unroll=True) or a grid
    #             axis so per-head f32 intermediates don't all stay live and spill vregs.
    for r in range(n_rep):
        q = qkv[:, r * head_dim:(r + 1) * head_dim]
        qr = rope(q).astype(compute_dtype)                    # 1/sqrt(Dh) already in wq

        scores = jnp.dot(qr, krT, preferred_element_type=jnp.float32)   # (S, S) f32

        # Non-causal softmax in f32 (reference masked_fill is a discarded no-op).
        m = jnp.max(scores, axis=-1, keepdims=True)
        e = jnp.exp(scores - m)
        inv = pl.reciprocal(jnp.sum(e, axis=-1, keepdims=True), approx=True)  # EUP
        p = (e * inv).astype(compute_dtype)

        heads.append(jnp.dot(p, vc, preferred_element_type=jnp.float32))      # (S, Dh)

    # Fused output projection for this kv-group: one K = n_rep*Dh matmul, then
    # accumulate into the resident per-batch (S, dim) f32 output block.
    group = jnp.concatenate(heads, axis=-1).astype(compute_dtype)   # (S, n_rep*Dh)
    o_ref[0] += jnp.dot(group, wo_g, preferred_element_type=jnp.float32)


# ------------------------------- wrapper ------------------------------------- #
def self_attention_pallas(x, wq, wk, wv, wo, cos_tab, sin_tab,
                          n_heads, n_kv_heads, compute_dtype=jnp.bfloat16):
    """x: (B, S, dim) f32.  Weights follow PyTorch nn.Linear layout (out, in)."""
    B, S, dim = x.shape
    head_dim = dim // n_heads
    n_rep = n_heads // n_kv_heads
    scale = 1.0 / math.sqrt(head_dim)

    # De-interleave permutation of head_dim: [0,2,4,...,1,3,5,...] folded into wq/wk.
    perm = np.concatenate([np.arange(0, head_dim, 2), np.arange(1, head_dim, 2)])

    # wq: (H*Dh, dim) -> (dim, H, Dh) with column perm -> (H, dim, Dh); same for wk.
    wq3 = wq.T.reshape(dim, n_heads, head_dim)[:, :, perm].transpose(1, 0, 2)
    wk3 = wk.T.reshape(dim, n_kv_heads, head_dim)[:, :, perm].transpose(1, 0, 2)
    wv3 = wv.T.reshape(dim, n_kv_heads, head_dim).transpose(1, 0, 2)

    # Fold 1/sqrt(Dh) into wq (RoPE is linear -> exact), build the per-kv-head fused
    # weight tile [wq of its n_rep query heads | wk | wv], pre-cast to bf16.
    wq4 = (wq3 * scale).reshape(n_kv_heads, n_rep, dim, head_dim)
    wq4 = wq4.transpose(0, 2, 1, 3).reshape(n_kv_heads, dim, n_rep * head_dim)
    wqkv = jnp.concatenate([wq4, wk3, wv3], axis=-1).astype(compute_dtype)

    # wo^T split into per-kv-group row slabs, pre-cast to bf16.
    wo_slabs = wo.T.reshape(n_kv_heads, n_rep * head_dim, dim).astype(compute_dtype)

    # RoPE tables in de-interleaved (rotate-half) layout, kept f32.
    cos_d = jnp.concatenate([cos_tab, cos_tab], axis=-1)     # (S, Dh)
    sin_s = jnp.concatenate([-sin_tab, sin_tab], axis=-1)    # (S, Dh)

    x_bf = x.astype(compute_dtype)
    qkv_cols = (n_rep + 2) * head_dim

    out = pl.pallas_call(
        functools.partial(_attn_kernel, n_rep=n_rep, head_dim=head_dim,
                          compute_dtype=compute_dtype),
        out_shape=jax.ShapeDtypeStruct((B, S, dim), jnp.float32),
        grid=(B, n_kv_heads),
        in_specs=[
            pl.BlockSpec((1, S, dim), lambda b, g: (b, 0, 0)),            # x: resident per b
            pl.BlockSpec((1, dim, qkv_cols), lambda b, g: (g, 0, 0)),     # fused QKV weights
            pl.BlockSpec((1, n_rep * head_dim, dim), lambda b, g: (g, 0, 0)),  # wo slab
            pl.BlockSpec((S, head_dim), lambda b, g: (0, 0)),             # cos (invariant)
            pl.BlockSpec((S, head_dim), lambda b, g: (0, 0)),             # sin (invariant)
        ],
        out_specs=pl.BlockSpec((1, S, dim), lambda b, g: (b, 0, 0)),      # accumulator over g
        compiler_params=pltpu.CompilerParams(
            dimension_semantics=("parallel", "arbitrary")),
    )(x_bf, wqkv, wo_slabs, cos_d, sin_s)
    return out


# --------------------------- pure-JAX reference ------------------------------ #
def _rope_interleaved_ref(x, cos, sin):
    # x: (B,S,H,Dh); cos/sin: (S, Dh//2) — exact interleaved (complex) formulation
    B, S, H, Dh = x.shape
    xr = x.reshape(B, S, H, Dh // 2, 2)
    xe, xo = xr[..., 0], xr[..., 1]
    c = cos[None, :, None, :]
    s = sin[None, :, None, :]
    oe = xe * c - xo * s
    oo = xe * s + xo * c
    return jnp.stack([oe, oo], axis=-1).reshape(B, S, H, Dh)


def self_attention_ref(x, wq, wk, wv, wo, cos_tab, sin_tab, n_heads, n_kv_heads):
    B, S, dim = x.shape
    head_dim = dim // n_heads
    n_rep = n_heads // n_kv_heads

    xq = (x @ wq.T).reshape(B, S, n_heads, head_dim)
    xk = (x @ wk.T).reshape(B, S, n_kv_heads, head_dim)
    xv = (x @ wv.T).reshape(B, S, n_kv_heads, head_dim)
    xq = _rope_interleaved_ref(xq, cos_tab, sin_tab)
    xk = _rope_interleaved_ref(xk, cos_tab, sin_tab)
    xk = jnp.repeat(xk, n_rep, axis=2)
    xv = jnp.repeat(xv, n_rep, axis=2)
    xq = xq.transpose(0, 2, 1, 3)
    xk = xk.transpose(0, 2, 1, 3)
    xv = xv.transpose(0, 2, 1, 3)
    scores = jnp.einsum("bhqd,bhkd->bhqk", xq, xk) / math.sqrt(head_dim)
    # (causal mask in reference PyTorch is a discarded non-inplace masked_fill -> no-op)
    probs = jax.nn.softmax(scores, axis=-1)
    out = jnp.einsum("bhqk,bhkd->bhqd", probs, xv)
    out = out.transpose(0, 2, 1, 3).reshape(B, S, n_heads * head_dim)
    return out @ wo.T


# ---------------------------------- main ------------------------------------ #
if __name__ == "__main__":
    # ModelArgs-equivalent small config (head_dim = 128 so every tile is lane-dense).
    dim = 512
    n_heads = 4
    n_kv_heads = 2
    max_seq_len = 16
    B, S = 2, max_seq_len
    head_dim = dim // n_heads

    key = jax.random.PRNGKey(0)
    kx, kq, kk, kv, ko = jax.random.split(key, 5)

    x = jax.random.normal(kx, (B, S, dim), dtype=jnp.float32)

    # nn.Linear default-style init: U(-1/sqrt(fan_in), 1/sqrt(fan_in)), weight shape (out, in)
    def linear_w(k, out_f, in_f):
        bound = 1.0 / math.sqrt(in_f)
        return jax.random.uniform(k, (out_f, in_f), jnp.float32, -bound, bound)

    wq = linear_w(kq, n_heads * head_dim, dim)
    wk = linear_w(kk, n_kv_heads * head_dim, dim)
    wv = linear_w(kv, n_kv_heads * head_dim, dim)
    wo = linear_w(ko, dim, n_heads * head_dim)

    # precompute_theta_pos_frequencies: theta_i = 10000^(-2i/Dh), freqs[m,i] = m*theta_i
    theta = 1.0 / (10000.0 ** (jnp.arange(0, head_dim, 2, dtype=jnp.float32) / head_dim))
    m_pos = jnp.arange(S, dtype=jnp.float32)
    freqs = jnp.outer(m_pos, theta)                     # (S, Dh/2)
    cos_tab = jnp.cos(freqs)
    sin_tab = jnp.sin(freqs)

    run = jax.jit(functools.partial(
        self_attention_pallas, n_heads=n_heads, n_kv_heads=n_kv_heads,
        compute_dtype=jnp.bfloat16))
    out = run(x, wq, wk, wv, wo, cos_tab, sin_tab)
    out = jax.block_until_ready(out)

    ref = self_attention_ref(x, wq, wk, wv, wo, cos_tab, sin_tab, n_heads, n_kv_heads)
    # bf16 MXU operands / bf16 x+weights (f32 accumulation) -> relaxed tolerance vs f32 ref.
    np.testing.assert_allclose(np.asarray(out), np.asarray(ref), rtol=2e-2, atol=2e-2)

    print("KERNEL_OK")
</pallas_src>

<mosaic_0001>
module attributes {stable_mosaic.version = 11 : i64} {
  func.func @_attn_kernel(%arg0: i32, %arg1: i32, %arg2: memref<1x16x512xbf16, #tpu.memory_space<vmem>>, %arg3: memref<1x512x512xbf16, #tpu.memory_space<vmem>>, %arg4: memref<1x256x512xbf16, #tpu.memory_space<vmem>>, %arg5: memref<16x128xf32, #tpu.memory_space<vmem>>, %arg6: memref<16x128xf32, #tpu.memory_space<vmem>>, %arg7: memref<1x16x512xf32, #tpu.memory_space<vmem>>) attributes {dimension_semantics = [#tpu.dimension_semantics<parallel>, #tpu.dimension_semantics<arbitrary>], iteration_bounds = array<i64: 2, 2>, scalar_prefetch = 0 : i64, scratch_operands = 0 : i64, tpu.core_type = #tpu.core_type<tc>, window_params = [{transform_indices = @transform_0, window_bounds = array<i64: 1, 16, 512>}, {transform_indices = @transform_1, window_bounds = array<i64: 1, 512, 512>}, {transform_indices = @transform_2, window_bounds = array<i64: 1, 256, 512>}, {pipeline_mode = #tpu.pipeline_mode<synchronous>, transform_indices = @transform_3, window_bounds = array<i64: 16, 128>}, {pipeline_mode = #tpu.pipeline_mode<synchronous>, transform_indices = @transform_4, window_bounds = array<i64: 16, 128>}, {transform_indices = @transform_5, window_bounds = array<i64: 1, 16, 512>}]} {
    %c0_i32 = arith.constant 0 : i32
    %0 = arith.cmpi eq, %arg1, %c0_i32 : i32
    %1 = arith.extui %0 : i1 to i32
    %c0_i32_0 = arith.constant 0 : i32
    %2 = arith.cmpi ne, %1, %c0_i32_0 : i32
    scf.if %2 {
      %cst_30 = arith.constant 0.000000e+00 : f32
      %68 = vector.broadcast %cst_30 : f32 to vector<1x16x512xf32>
      %c0_31 = arith.constant 0 : index
      %c0_32 = arith.constant 0 : index
      %c0_33 = arith.constant 0 : index
      %69 = vector.load %arg7[%c0_31, %c0_32, %c0_33] : memref<1x16x512xf32, #tpu.memory_space<vmem>>, vector<1x16x512xf32>
      tpu.vector_store %arg7[%c0_31, %c0_32, %c0_33], %68 {strides = array<i32>} : memref<1x16x512xf32, #tpu.memory_space<vmem>>, vector<1x16x512xf32>,
    } else {
    }
    %c0 = arith.constant 0 : index
    %c0_1 = arith.constant 0 : index
    %c0_2 = arith.constant 0 : index
    %3 = vector.load %arg2[%c0, %c0_1, %c0_2] : memref<1x16x512xbf16, #tpu.memory_space<vmem>>, vector<1x16x512xbf16>
    %4 = vector.shape_cast %3 : vector<1x16x512xbf16> to vector<16x512xbf16>
    %c0_3 = arith.constant 0 : index
    %c0_4 = arith.constant 0 : index
    %c0_5 = arith.constant 0 : index
    %5 = vector.load %arg3[%c0_3, %c0_4, %c0_5] : memref<1x512x512xbf16, #tpu.memory_space<vmem>>, vector<1x512x512xbf16>
    %6 = vector.shape_cast %5 : vector<1x512x512xbf16> to vector<512x512xbf16>
    %c0_6 = arith.constant 0 : index
    %c0_7 = arith.constant 0 : index
    %c0_8 = arith.constant 0 : index
    %7 = vector.load %arg4[%c0_6, %c0_7, %c0_8] : memref<1x256x512xbf16, #tpu.memory_space<vmem>>, vector<1x256x512xbf16>
    %8 = vector.shape_cast %7 : vector<1x256x512xbf16> to vector<256x512xbf16>
    %c0_9 = arith.constant 0 : index
    %c0_10 = arith.constant 0 : index
    %9 = vector.load %arg5[%c0_9, %c0_10] : memref<16x128xf32, #tpu.memory_space<vmem>>, vector<16x128xf32>
    %c0_11 = arith.constant 0 : index
    %c0_12 = arith.constant 0 : index
    %10 = vector.load %arg6[%c0_11, %c0_12] : memref<16x128xf32, #tpu.memory_space<vmem>>, vector<16x128xf32>
    %cst = arith.constant dense<0.000000e+00> : vector<16x512xf32>
    %11 = tpu.matmul %4, %6, %cst {dimension_numbers = #tpu.dot_dimension_numbers<[1], [0], [0], [1], [0, 0, 1, 1], [], []>} : vector<16x512xbf16>, vector<512x512xbf16>, vector<16x512xf32> -> vector<16x512xf32>
    %12 = vector.extract_strided_slice %11 {offsets = [0, 256], sizes = [16, 128], strides = [1, 1]} : vector<16x512xf32> to vector<16x128xf32>
    %13 = vector.extract_strided_slice %11 {offsets = [0, 384], sizes = [16, 128], strides = [1, 1]} : vector<16x512xf32> to vector<16x128xf32>
    %14 = arith.mulf %12, %9 : vector<16x128xf32>
    %c64_i32 = arith.constant 64 : i32
    %15 = tpu.dynamic_rotate %12 by %c64_i32 dim 1 : vector<16x128xf32>, i32 -> vector<16x128xf32>
    %16 = arith.mulf %15, %10 : vector<16x128xf32>
    %17 = arith.addf %14, %16 : vector<16x128xf32>
    %18 = tpu.transpose %17, [1, 0] : vector<16x128xf32> -> vector<128x16xf32>
    %19 = arith.truncf %18 : vector<128x16xf32> to vector<128x16xbf16>
    %20 = arith.truncf %13 : vector<16x128xf32> to vector<16x128xbf16>
    %21 = vector.extract_strided_slice %11 {offsets = [0, 0], sizes = [16, 128], strides = [1, 1]} : vector<16x512xf32> to vector<16x128xf32>
    %22 = arith.mulf %21, %9 : vector<16x128xf32>
    %c64_i32_13 = arith.constant 64 : i32
    %23 = tpu.dynamic_rotate %21 by %c64_i32_13 dim 1 : vector<16x128xf32>, i32 -> vector<16x128xf32>
    %24 = arith.mulf %23, %10 : vector<16x128xf32>
    %25 = arith.addf %22, %24 : vector<16x128xf32>
    %26 = arith.truncf %25 : vector<16x128xf32> to vector<16x128xbf16>
    %cst_14 = arith.constant dense<0.000000e+00> : vector<16x16xf32>
    %27 = tpu.matmul %26, %19, %cst_14 {dimension_numbers = #tpu.dot_dimension_numbers<[1], [0], [0], [1], [0, 0, 1, 1], [], []>} : vector<16x128xbf16>, vector<128x16xbf16>, vector<16x16xf32> -> vector<16x16xf32>
    %cst_15 = arith.constant dense<0xFF800000> : vector<16xf32>
    %28 = vector.multi_reduction <maximumf>, %27, %cst_15 [1] : vector<16x16xf32> to vector<16xf32>
    %29 = vector.shape_cast %28 : vector<16xf32> to vector<16x1xf32>
    %30 = vector.broadcast %29 : vector<16x1xf32> to vector<16x16xf32>
    %31 = arith.subf %27, %30 : vector<16x16xf32>
    %32 = math.exp %31 : vector<16x16xf32>
    %cst_16 = arith.constant dense<0.000000e+00> : vector<16xf32>
    %33 = vector.multi_reduction <add>, %32, %cst_16 [1] : vector<16x16xf32> to vector<16xf32>
    %34 = vector.shape_cast %33 : vector<16xf32> to vector<16x1xf32>
    %35 = tpu.reciprocal %34 {approx = true} : vector<16x1xf32> -> vector<16x1xf32>
    %36 = vector.broadcast %35 : vector<16x1xf32> to vector<16x16xf32>
    %37 = arith.mulf %32, %36 : vector<16x16xf32>
    %38 = arith.truncf %37 : vector<16x16xf32> to vector<16x16xbf16>
    %cst_17 = arith.constant dense<0.000000e+00> : vector<16x128xf32>
    %39 = tpu.matmul %38, %20, %cst_17 {dimension_numbers = #tpu.dot_dimension_numbers<[1], [0], [0], [1], [0, 0, 1, 1], [], []>} : vector<16x16xbf16>, vector<16x128xbf16>, vector<16x128xf32> -> vector<16x128xf32>
    %40 = vector.extract_strided_slice %11 {offsets = [0, 128], sizes = [16, 128], strides = [1, 1]} : vector<16x512xf32> to vector<16x128xf32>
    %41 = arith.mulf %40, %9 : vector<16x128xf32>
    %c64_i32_18 = arith.constant 64 : i32
    %42 = tpu.dynamic_rotate %40 by %c64_i32_18 dim 1 : vector<16x128xf32>, i32 -> vector<16x128xf32>
    %43 = arith.mulf %42, %10 : vector<16x128xf32>
    %44 = arith.addf %41, %43 : vector<16x128xf32>
    %45 = arith.truncf %44 : vector<16x128xf32> to vector<16x128xbf16>
    %cst_19 = arith.constant dense<0.000000e+00> : vector<16x16xf32>
    %46 = tpu.matmul %45, %19, %cst_19 {dimension_numbers = #tpu.dot_dimension_numbers<[1], [0], [0], [1], [0, 0, 1, 1], [], []>} : vector<16x128xbf16>, vector<128x16xbf16>, vector<16x16xf32> -> vector<16x16xf32>
    %cst_20 = arith.constant dense<0xFF800000> : vector<16xf32>
    %47 = vector.multi_reduction <maximumf>, %46, %cst_20 [1] : vector<16x16xf32> to vector<16xf32>
    %48 = vector.shape_cast %47 : vector<16xf32> to vector<16x1xf32>
    %49 = vector.broadcast %48 : vector<16x1xf32> to vector<16x16xf32>
    %50 = arith.subf %46, %49 : vector<16x16xf32>
    %51 = math.exp %50 : vector<16x16xf32>
    %cst_21 = arith.constant dense<0.000000e+00> : vector<16xf32>
    %52 = vector.multi_reduction <add>, %51, %cst_21 [1] : vector<16x16xf32> to vector<16xf32>
    %53 = vector.shape_cast %52 : vector<16xf32> to vector<16x1xf32>
    %54 = tpu.reciprocal %53 {approx = true} : vector<16x1xf32> -> vector<16x1xf32>
    %55 = vector.broadcast %54 : vector<16x1xf32> to vector<16x16xf32>
    %56 = arith.mulf %51, %55 : vector<16x16xf32>
    %57 = arith.truncf %56 : vector<16x16xf32> to vector<16x16xbf16>
    %cst_22 = arith.constant dense<0.000000e+00> : vector<16x128xf32>
    %58 = tpu.matmul %57, %20, %cst_22 {dimension_numbers = #tpu.dot_dimension_numbers<[1], [0], [0], [1], [0, 0, 1, 1], [], []>} : vector<16x16xbf16>, vector<16x128xbf16>, vector<16x128xf32> -> vector<16x128xf32>
    %59 = tpu.concatenate %39, %58 in 1 : vector<16x128xf32>, vector<16x128xf32> -> vector<16x256xf32>
    %60 = arith.truncf %59 : vector<16x256xf32> to vector<16x256xbf16>
    %c0_23 = arith.constant 0 : index
    %c0_24 = arith.constant 0 : index
    %c0_25 = arith.constant 0 : index
    %61 = vector.load %arg7[%c0_23, %c0_24, %c0_25] : memref<1x16x512xf32, #tpu.memory_space<vmem>>, vector<1x16x512xf32>
    %62 = vector.shape_cast %61 : vector<1x16x512xf32> to vector<16x512xf32>
    %cst_26 = arith.constant dense<0.000000e+00> : vector<16x512xf32>
    %63 = tpu.matmul %60, %8, %cst_26 {dimension_numbers = #tpu.dot_dimension_numbers<[1], [0], [0], [1], [0, 0, 1, 1], [], []>} : vector<16x256xbf16>, vector<256x512xbf16>, vector<16x512xf32> -> vector<16x512xf32>
    %64 = arith.addf %62, %63 : vector<16x512xf32>
    %c0_27 = arith.constant 0 : index
    %c0_28 = arith.constant 0 : index
    %c0_29 = arith.constant 0 : index
    %65 = vector.load %arg7[%c0_27, %c0_28, %c0_29] : memref<1x16x512xf32, #tpu.memory_space<vmem>>, vector<1x16x512xf32>
    %66 = vector.shape_cast %65 : vector<1x16x512xf32> to vector<16x512xf32>
    %67 = vector.shape_cast %64 : vector<16x512xf32> to vector<1x16x512xf32>
    tpu.vector_store %arg7[%c0_27, %c0_28, %c0_29], %67 {strides = array<i32>} : memref<1x16x512xf32, #tpu.memory_space<vmem>>, vector<1x16x512xf32>,
    return
  }
  func.func @transform_0(%arg0: i32, %arg1: i32) -> (i32, i32, i32) {
    %c0_i32 = arith.constant 0 : i32
    %c0_i32_0 = arith.constant 0 : i32
    %c0_i32_1 = arith.constant 0 : i32
    return %arg0, %c0_i32, %c0_i32_0 : i32, i32, i32
  }
  func.func @transform_1(%arg0: i32, %arg1: i32) -> (i32, i32, i32) {
    %c0_i32 = arith.constant 0 : i32
    %c0_i32_0 = arith.constant 0 : i32
    %c0_i32_1 = arith.constant 0 : i32
    return %arg1, %c0_i32, %c0_i32_0 : i32, i32, i32
  }
  func.func @transform_2(%arg0: i32, %arg1: i32) -> (i32, i32, i32) {
    %c0_i32 = arith.constant 0 : i32
    %c0_i32_0 = arith.constant 0 : i32
    %c0_i32_1 = arith.constant 0 : i32
    return %arg1, %c0_i32, %c0_i32_0 : i32, i32, i32
  }
  func.func @transform_3(%arg0: i32, %arg1: i32) -> (i32, i32) {
    %c0_i32 = arith.constant 0 : i32
    %c0_i32_0 = arith.constant 0 : i32
    %c0_i32_1 = arith.constant 0 : i32
    return %c0_i32, %c0_i32_0 : i32, i32
  }
  func.func @transform_4(%arg0: i32, %arg1: i32) -> (i32, i32) {
    %c0_i32 = arith.constant 0 : i32
    %c0_i32_0 = arith.constant 0 : i32
    %c0_i32_1 = arith.constant 0 : i32
    return %c0_i32, %c0_i32_0 : i32, i32
  }
  func.func @transform_5(%arg0: i32, %arg1: i32) -> (i32, i32, i32) {
    %c0_i32 = arith.constant 0 : i32
    %c0_i32_0 = arith.constant 0 : i32
    %c0_i32_1 = arith.constant 0 : i32
    return %arg0, %c0_i32, %c0_i32_0 : i32, i32, i32
  }
}

</mosaic_0001>

<bundles_post_ra>
// kernel: neg.1
= control target key start
LH: loop header
LB: loop body
LE: loop exit
PB: predicated region body
PF: predicated region fallthrough
CT: control target
= control target key end

     0   :  { %s40_s0 = inlined_call_operand.vmem [shape: f32[16,64], index: 0, kind: input, shape index: {}]   ;;  %s41_s1 = inlined_call_operand.vmem [shape: f32[16,64], index: 1, kind: output, shape index: {}]  }
   0x1   :  { %v2_v0 = vld [vmem:[%s40_s0] sm:$0xff]  ;;  %v16_v1 = vld [vmem:[%s40_s0 + $0x8] sm:$0xff] }
   0x2   :  { %v5_v2 = vxor.u32 2147483648, %v2_v0  ;;  %v12_v3 = vxor.u32 2147483648, %v16_v1 }
   0x4   :  { %7 = vst [vmem:[%s41_s1] sm:$0xff] %v5_v2  ;;  %17 = vst [vmem:[%s41_s1 + $0x8] sm:$0xff] %v12_v3 }

// kernel: self_attention_pallas.1
= control target key start
LH: loop header
LB: loop body
LE: loop exit
PB: predicated region body
PF: predicated region fallthrough
CT: control target
= control target key end

     0   :  { %10 = vsyncpa [#allocation3], 0  ;;  %s3484_s0 = inlined_call_operand.vmem [shape: bf16[2,16,512], index: 0, kind: input, shape index: {}]   ;;  %s3485_s1 = inlined_call_operand.vmem [shape: bf16[2,512,512], index: 1, kind: input, shape index: {}]   ;;  %s3486_s2 = inlined_call_operand.vmem [shape: bf16[2,256,512], index: 2, kind: input, shape index: {}]   ;;  %s3487_s3 = inlined_call_operand.vmem [shape: f32[16,128], index: 3, kind: input, shape index: {}]   ;;  %s3488_s4 = inlined_call_operand.vmem [shape: f32[16,128], index: 4, kind: input, shape index: {}]   ;;  %s3489_s5 = inlined_call_operand.hbm [shape: f32[2,16,512], index: 5, kind: output, shape index: {}]  }
   0x1   :  { %12 = vsyncpa [#allocation3 + $0x1], 0  ;;  %s2975_s18 = smov 0   ;;  %s2977_s19 = smov 0  }
   0x2   :  { %s2979_s20 = smov 0   ;;  %s2981_s21 = smov 0  }
   0x3   :  { %s2983_s22 = smov 0   ;;  %s2985_s23 = smov 0  }
   0x4   :  { %s2987_s24 = smov 0   ;;  %s2989_s25 = smov 0  }
   0x5 LB: > { %3494 = sst [smem:[#allocation5_spill]] %s2928_s23  ;;  %s2153_s26 = sadd.s32 4294967295, %s2936_s25   ;;  %s2936_s25 = sphi %s2989_s25, %s18_s25   ;;  %s2932_s24 = sphi %s2987_s24, %s3504_s24   ;;  %s2928_s23 = sphi %s2985_s23, %s3503_s23   ;;  %s2924_s22 = sphi %s2983_s22, %s3502_s22   ;;  %s2920_s21 = sphi %s2981_s21, %s3501_s21   ;;  %s2916_s20 = sphi %s2979_s20, %s3507_s20   ;;  %s2912_s19 = sphi %s2977_s19, %s3506_s19   ;;  %s2908_s18 = sphi %s2975_s18, %s3505_s18  }
   0x6   : > { %3495 = sst [smem:[#allocation6_spill]] %s2932_s24  ;;  %s2154_s27 = sadd.s32 4294967294, %s2936_s25  }
   0x7   : > { %s27_s28 = sadd.s32 1, %s2928_s23  ;;  %s30_s29 = sadd.s32 1, %s2932_s24 }
   0x8   : > { %p28_p0 = scmp.ge.s32.totalorder %s27_s28, 2  ;;  %p167_p1 = scmp.ne.s32.totalorder %s2916_s20, %s2912_s19 }
   0x9   : > { %p168_p2 = scmp.eq.s32.totalorder %s2153_s26, 3  ;;  %p173_p4 = scmp.ne.s32.totalorder %s2912_s19, %s2908_s18 }
   0xa   : > { %s3509_s28 = smov (%p28_p0, %s27_s28), 0  ;;  %s3511_s29 = smov (!%p28_p0, %s30_s29), %s2932_s24 }
   0xb   : > { %3496 = sst [smem:[#allocation7_spill]] %s3509_s28  ;;  %p3024_p3 = por %p168_p2, %p167_p1 }
   0xc   : > { %p32_p5 = scmp.ge.s32.totalorder %s3511_s29, 2  ;;  %p174_p6 = scmp.eq.s32.totalorder %s2154_s27, 3 }
   0xd   : > { %p2157_p7 = scmp.ge.s32.totalorder %s2936_s25, 1  ;;  %p222_p8 = scmp.lt.s32.totalorder %s2936_s25, 5 }
   0xe   : > { %s3513_s29 = smov (%p32_p5, %s3511_s29), 0  ;;  %p3034_p9 = por %p174_p6, %p173_p4 }
   0xf   : > { %3498 = sst [smem:[#allocation8_spill]] %s3513_s29  ;;  %p223_p10 = pnand %p2157_p7, %p222_p8 }
  0x10   : > { %s154_s7 = ssub.s32 %s2932_s24, %s3513_s29  ;;  %s157_s8 = sadd.s32 1, %s2916_s20 }
  0x11   : > { %p155_p11 = scmp.eq.s32.totalorder %s154_s7, 0  ;;  %226 = sbr.rel (%p223_p10) target bundleno = 2249 (0x8c9), region = 40 }
  0x12   : > { %s3492_s10 = sand.u32 (!%p223_p10), 1, %s2912_s19   ;;  %p260_p12 = scmp.lt.s32.totalorder (!%p223_p10), %s2924_s22, 1 }
  0x13   : > { %s3042_s9 = scalar_select %p155_p11, %s2916_s20, %s157_s8  }
  0x14   : > { %s2158_s11 = sshll.u32 (!%p223_p10), %s3492_s10, 6  ;;  %p265_p13 = scmp.lt.s32.totalorder (!%p223_p10), %s2920_s21, 1 }
  0x15   : > { %s3066_s23 = scalar_lea.vmem (!%p223_p10), [#allocation2], %s2158_s11  ;;  %p2165_p0 = scmp.ne.s32.totalorder (!%p223_p10), %s2920_s21, 0 }
  0x18   : > { %s261_s12 = scalar_select %p260_p12, %s2924_s22, 1 }
  0x19   : > { %s266_s13 = scalar_select %p265_p13, %s2920_s21, 1 }
  0x1a   : > { %s2369_s14 = sshll.u32 %s261_s12, 5  ;;  %279 = sbr.rel (%p2165_p0) target bundleno = 33 (0x21), region = 44  ;;  %v2938_v0 = vmov (!%p2165_p0), 0.0  }
  0x1b   : > { %s3054_s17 = scalar_lea.vmem %s3484_s0, %s2369_s14  ;;  %s2370_s26 = sshll.u32 %s266_s13, 10  ;;  %280 = vst [vmem:[%s3066_s23] sm:$0xff] (!%p2165_p0), %v2938_v0  ;;  %281 = vst [vmem:[%s3066_s23 + $0x8] sm:$0xff] (!%p2165_p0), %v2938_v0 }
  0x1c   : > { %s3059_s8 = scalar_lea.vmem %s3485_s1, %s2370_s26  ;;  %s2371_s29 = sshll.u32 %s266_s13, 9  ;;  %282 = vst [vmem:[%s3066_s23 + $0x10] sm:$0xff] (!%p2165_p0), %v2938_v0  ;;  %283 = vst [vmem:[%s3066_s23 + $0x18] sm:$0xff] (!%p2165_p0), %v2938_v0 }
  0x1d   : > { %s3064_s10 = scalar_lea.vmem %s3486_s2, %s2371_s29  ;;  %284 = vst [vmem:[%s3066_s23 + $0x20] sm:$0xff] (!%p2165_p0), %v2938_v0  ;;  %285 = vst [vmem:[%s3066_s23 + $0x28] sm:$0xff] (!%p2165_p0), %v2938_v0 }
  0x1e   : > { %286 = vst [vmem:[%s3066_s23 + $0x30] sm:$0xff] (!%p2165_p0), %v2938_v0  ;;  %287 = vst [vmem:[%s3066_s23 + $0x38] sm:$0xff] (!%p2165_p0), %v2938_v0 }
  0x21 PF: > { %v2532_v1 = vld [vmem:[%s3059_s8 + $0xc] ss:$16 sps:$4 sm:$0xff]   ;;  %v2534_v2 = vld [vmem:[%s3059_s8 + $0x8] ss:$16 sps:$4 sm:$0xff]   ;;  %v2555_v9 = vld [vmem:[%s3059_s8 + $0x4] ss:$16 sps:$4 sm:$0xff]  }
  0x22   : > { %1234 = vmatprep.subr.bf16.mxu1 %v2532_v1  ;;  %v2535_v3 = vld [vmem:[%s3059_s8 + $0x2c] ss:$16 sps:$4 sm:$0xff]   ;;  %v2537_v4 = vld [vmem:[%s3059_s8 + $0x28] ss:$16 sps:$4 sm:$0xff]   ;;  %v2558_v10 = vld [vmem:[%s3059_s8] ss:$16 sps:$4 sm:$0xff]   ;;  %1148 = vmatprep.subr.bf16.mxu0 %v2555_v9 }
  0x23   : > { %1235 = vmatpush1.bf16.msra.mxu1 %v2534_v2  ;;  %v2538_v5 = vld [vmem:[%s3059_s8 + $0x4c] ss:$16 sps:$4 sm:$0xff]   ;;  %v2540_v6 = vld [vmem:[%s3059_s8 + $0x48] ss:$16 sps:$4 sm:$0xff]   ;;  %v2561_v12 = vld [vmem:[%s3059_s8 + $0x24] ss:$16 sps:$4 sm:$0xff]   ;;  %1149 = vmatpush1.bf16.msra.mxu0 %v2558_v10 }
  0x24   : > { %1236 = vmatprep.subr.bf16.mxu1 %v2535_v3  ;;  %v2541_v7 = vld [vmem:[%s3059_s8 + $0x6c] ss:$16 sps:$4 sm:$0xff]   ;;  %v2543_v8 = vld [vmem:[%s3059_s8 + $0x68] ss:$16 sps:$4 sm:$0xff]   ;;  %v2564_v13 = vld [vmem:[%s3059_s8 + $0x20] ss:$16 sps:$4 sm:$0xff]   ;;  %1150 = vmatprep.subr.bf16.mxu0 %v2561_v12 }
  0x25   : > { %v2544_v11 = vld [vmem:[%s3059_s8 + $0x8c] ss:$16 sps:$4 sm:$0xff]   ;;  %v2546_v14 = vld [vmem:[%s3059_s8 + $0x88] ss:$16 sps:$4 sm:$0xff]   ;;  %v2567_v16 = vld [vmem:[%s3059_s8 + $0x44] ss:$16 sps:$4 sm:$0xff]  }
  0x26   : > { %v2547_v15 = vld [vmem:[%s3059_s8 + $0xac] ss:$16 sps:$4 sm:$0xff]   ;;  %v2570_v17 = vld [vmem:[%s3059_s8 + $0x40] ss:$16 sps:$4 sm:$0xff]   ;;  %v2549_v18 = vld [vmem:[%s3059_s8 + $0xa8] ss:$16 sps:$4 sm:$0xff]  }
  0x27   : > { %1237 = vmatpush1.bf16.msra.mxu1 %v2537_v4  ;;  %1151 = vmatpush1.bf16.msra.mxu0 %v2564_v13  ;;  %v2573_v19 = vld [vmem:[%s3059_s8 + $0x64] ss:$16 sps:$4 sm:$0xff]   ;;  %v2550_v20 = vld [vmem:[%s3059_s8 + $0xcc] ss:$16 sps:$4 sm:$0xff]   ;;  %v2552_v21 = vld [vmem:[%s3059_s8 + $0xc8] ss:$16 sps:$4 sm:$0xff]  }
  0x28   : > { %1238 = vmatprep.subr.bf16.mxu1 %v2538_v5  ;;  %1152 = vmatprep.subr.bf16.mxu0 %v2567_v16  ;;  %v2576_v22 = vld [vmem:[%s3059_s8 + $0x60] ss:$16 sps:$4 sm:$0xff]   ;;  %v2579_v23 = vld [vmem:[%s3059_s8 + $0x84] ss:$16 sps:$4 sm:$0xff]   ;;  %v2553_v24 = vld [vmem:[%s3059_s8 + $0xec] ss:$16 sps:$4 sm:$0xff]  }
  0x29   : > { %v2582_v25 = vld [vmem:[%s3059_s8 + $0x80] ss:$16 sps:$4 sm:$0xff]   ;;  %v2557_v26 = vld [vmem:[%s3059_s8 + $0xe8] ss:$16 sps:$4 sm:$0xff]   ;;  %v2585_v27 = vld [vmem:[%s3059_s8 + $0xa4] ss:$16 sps:$4 sm:$0xff]  }
  0x2a   : > { %v2559_v28 = vld [vmem:[%s3059_s8 + $0x10c] ss:$16 sps:$4 sm:$0xff]   ;;  %v2563_v29 = vld [vmem:[%s3059_s8 + $0x108] ss:$16 sps:$4 sm:$0xff]   ;;  %v2588_v30 = vld [vmem:[%s3059_s8 + $0xa0] ss:$16 sps:$4 sm:$0xff]  }
  0x2b   : > { %1239 = vmatpush1.bf16.msra.mxu1 %v2540_v6  ;;  %1153 = vmatpush1.bf16.msra.mxu0 %v2570_v17  ;;  %v2591_v31 = vld [vmem:[%s3059_s8 + $0xc4] ss:$16 sps:$4 sm:$0xff]   ;;  %v2565_v32 = vld [vmem:[%s3059_s8 + $0x12c] ss:$16 sps:$4 sm:$0xff]   ;;  %v2594_v33 = vld [vmem:[%s3059_s8 + $0xc0] ss:$16 sps:$4 sm:$0xff]  }
  0x2c   : > { %1240 = vmatprep.subr.bf16.mxu1 %v2541_v7  ;;  %1154 = vmatprep.subr.bf16.mxu0 %v2573_v19  ;;  %v2609_v34 = vld [vmem:[%s3054_s17 + $0x4] ss:$16 sps:$4 sm:$0xff]   ;;  %v2569_v35 = vld [vmem:[%s3059_s8 + $0x128] ss:$16 sps:$4 sm:$0xff]   ;;  %v2571_v37 = vld [vmem:[%s3059_s8 + $0x14c] ss:$16 sps:$4 sm:$0xff]  }
  0x2d   : > { %v2597_v36 = vld [vmem:[%s3059_s8 + $0xe4] ss:$16 sps:$4 sm:$0xff]   ;;  %1266 = vmatprep.mubr.bf16.mxu1 %v2609_v34  ;;  %1180 = vmatprep.mubr.bf16.mxu0 %v2609_v34  ;;  %v2600_v38 = vld [vmem:[%s3059_s8 + $0xe0] ss:$16 sps:$4 sm:$0xff]   ;;  %v2575_v39 = vld [vmem:[%s3059_s8 + $0x148] ss:$16 sps:$4 sm:$0xff]  }
  0x2e   : > { %v2603_v40 = vld [vmem:[%s3059_s8 + $0x104] ss:$16 sps:$4 sm:$0xff]   ;;  %v2577_v41 = vld [vmem:[%s3059_s8 + $0x16c] ss:$16 sps:$4 sm:$0xff]   ;;  %v2606_v42 = vld [vmem:[%s3059_s8 + $0x100] ss:$16 sps:$4 sm:$0xff]  }
  0x2f   : > { %1241 = vmatpush1.bf16.msra.mxu1 %v2543_v8  ;;  %1155 = vmatpush1.bf16.msra.mxu0 %v2576_v22  ;;  %v2581_v43 = vld [vmem:[%s3059_s8 + $0x168] ss:$16 sps:$4 sm:$0xff]   ;;  %v2613_v44 = vld [vmem:[%s3059_s8 + $0x124] ss:$16 sps:$4 sm:$0xff]   ;;  %v2583_v45 = vld [vmem:[%s3059_s8 + $0x18c] ss:$16 sps:$4 sm:$0xff]  }
  0x30   : > { %1242 = vmatprep.subr.bf16.mxu1 %v2544_v11  ;;  %1156 = vmatprep.subr.bf16.mxu0 %v2579_v23  ;;  %v2615_v46 = vld [vmem:[%s3059_s8 + $0x120] ss:$16 sps:$4 sm:$0xff]   ;;  %v2587_v47 = vld [vmem:[%s3059_s8 + $0x188] ss:$16 sps:$4 sm:$0xff]   ;;  %v2619_v48 = vld [vmem:[%s3059_s8 + $0x144] ss:$16 sps:$4 sm:$0xff]  }
  0x31   : > { %v2589_v49 = vld [vmem:[%s3059_s8 + $0x1ac] ss:$16 sps:$4 sm:$0xff]   ;;  %v2621_v50 = vld [vmem:[%s3059_s8 + $0x140] ss:$16 sps:$4 sm:$0xff]   ;;  %v2593_v51 = vld [vmem:[%s3059_s8 + $0x1a8] ss:$16 sps:$4 sm:$0xff]  }
  0x32   : > { %v2625_v52 = vld [vmem:[%s3059_s8 + $0x164] ss:$16 sps:$4 sm:$0xff]   ;;  %v2595_v53 = vld [vmem:[%s3059_s8 + $0x1cc] ss:$16 sps:$4 sm:$0xff]   ;;  %v2627_v54 = vld [vmem:[%s3059_s8 + $0x160] ss:$16 sps:$4 sm:$0xff]  }
  0x33   : > { %1243 = vmatpush1.bf16.msra.mxu1 %v2546_v14  ;;  %1157 = vmatpush1.bf16.msra.mxu0 %v2582_v25  ;;  %v2599_v55 = vld [vmem:[%s3059_s8 + $0x1c8] ss:$16 sps:$4 sm:$0xff]   ;;  %v2631_v56 = vld [vmem:[%s3059_s8 + $0x184] ss:$16 sps:$4 sm:$0xff]   ;;  %v2601_v57 = vld [vmem:[%s3059_s8 + $0x1ec] ss:$16 sps:$4 sm:$0xff]  }
  0x34   : > { %1244 = vmatprep.subr.bf16.mxu1 %v2547_v15  ;;  %1158 = vmatprep.subr.bf16.mxu0 %v2585_v27  ;;  %v2633_v58 = vld [vmem:[%s3059_s8 + $0x180] ss:$16 sps:$4 sm:$0xff]   ;;  %v2605_v59 = vld [vmem:[%s3059_s8 + $0x1e8] ss:$16 sps:$4 sm:$0xff]   ;;  %v2637_v60 = vld [vmem:[%s3059_s8 + $0x1a4] ss:$16 sps:$4 sm:$0xff]  }
  0x35   : > { %v2612_v61 = vld [vmem:[%s3059_s8 + $0x20c] ss:$16 sps:$4 sm:$0xff]   ;;  %v2607_v62 = vld [vmem:[%s3054_s17] ss:$16 sps:$4 sm:$0xff]   ;;  %v2610_v0 = vld [vmem:[%s3059_s8 + $0x208] ss:$16 sps:$4 sm:$0xff]  }
  0x36   : > { %v2639_v63 = vld [vmem:[%s3059_s8 + $0x1a0] ss:$16 sps:$4 sm:$0xff]   ;;  %v2643_v1 = vld [vmem:[%s3059_s8 + $0x1c4] ss:$16 sps:$4 sm:$0xff]   ;;  %v2618_v2 = vld [vmem:[%s3059_s8 + $0x22c] ss:$16 sps:$4 sm:$0xff]  }
  0x37   : > { %1245 = vmatpush1.bf16.msra.mxu1 %v2549_v18  ;;  %1159 = vmatpush1.bf16.msra.mxu0 %v2588_v30  ;;  %v2645_v3 = vld [vmem:[%s3059_s8 + $0x1c0] ss:$16 sps:$4 sm:$0xff]   ;;  %v2616_v4 = vld [vmem:[%s3059_s8 + $0x228] ss:$16 sps:$4 sm:$0xff]   ;;  %v2649_v5 = vld [vmem:[%s3059_s8 + $0x1e4] ss:$16 sps:$4 sm:$0xff]  }
  0x38   : > { %1246 = vmatprep.subr.bf16.mxu1 %v2550_v20  ;;  %1160 = vmatprep.subr.bf16.mxu0 %v2591_v31  ;;  %v2624_v6 = vld [vmem:[%s3059_s8 + $0x24c] ss:$16 sps:$4 sm:$0xff]   ;;  %v2651_v7 = vld [vmem:[%s3059_s8 + $0x1e0] ss:$16 sps:$4 sm:$0xff]   ;;  %v2622_v8 = vld [vmem:[%s3059_s8 + $0x248] ss:$16 sps:$4 sm:$0xff]  }
  0x39   : > { %v2657_v9 = vld [vmem:[%s3059_s8 + $0x204] ss:$16 sps:$4 sm:$0xff]   ;;  %v2630_v10 = vld [vmem:[%s3059_s8 + $0x26c] ss:$16 sps:$4 sm:$0xff]   ;;  %v2655_v11 = vld [vmem:[%s3059_s8 + $0x200] ss:$16 sps:$4 sm:$0xff]  }
  0x3a   : > { %v2628_v12 = vld [vmem:[%s3059_s8 + $0x268] ss:$16 sps:$4 sm:$0xff]   ;;  %v2663_v13 = vld [vmem:[%s3059_s8 + $0x224] ss:$16 sps:$4 sm:$0xff]   ;;  %v2636_v14 = vld [vmem:[%s3059_s8 + $0x28c] ss:$16 sps:$4 sm:$0xff]  }
  0x3b   : > { %1247 = vmatpush1.bf16.msra.mxu1 %v2552_v21  ;;  %1161 = vmatpush1.bf16.msra.mxu0 %v2594_v33  ;;  %v2661_v15 = vld [vmem:[%s3059_s8 + $0x220] ss:$16 sps:$4 sm:$0xff]   ;;  %v2708_v16 = vld [vmem:[%s3054_s17 + $0xc] ss:$16 sps:$4 sm:$0xff]   ;;  %v2634_v17 = vld [vmem:[%s3059_s8 + $0x288] ss:$16 sps:$4 sm:$0xff]  }
  0x3c   : > { %1248 = vmatprep.subr.bf16.mxu1 %v2553_v24  ;;  %1162 = vmatprep.subr.bf16.mxu0 %v2597_v36  ;;  %v2669_v18 = vld [vmem:[%s3059_s8 + $0x244] ss:$16 sps:$4 sm:$0xff]   ;;  %v2642_v19 = vld [vmem:[%s3059_s8 + $0x2ac] ss:$16 sps:$4 sm:$0xff]   ;;  %v2667_v20 = vld [vmem:[%s3059_s8 + $0x240] ss:$16 sps:$4 sm:$0xff]  }
  0x3d   : > { %v2640_v21 = vld [vmem:[%s3059_s8 + $0x2a8] ss:$16 sps:$4 sm:$0xff]   ;;  %v2675_v22 = vld [vmem:[%s3059_s8 + $0x264] ss:$16 sps:$4 sm:$0xff]   ;;  %v2648_v23 = vld [vmem:[%s3059_s8 + $0x2cc] ss:$16 sps:$4 sm:$0xff]  }
  0x3e   : > { %v2646_v24 = vld [vmem:[%s3059_s8 + $0x2c8] ss:$16 sps:$4 sm:$0xff]   ;;  %v2673_v25 = vld [vmem:[%s3059_s8 + $0x260] ss:$16 sps:$4 sm:$0xff]   ;;  %v2681_v27 = vld [vmem:[%s3059_s8 + $0x284] ss:$16 sps:$4 sm:$0xff]  }
  0x3f   : > { %1249 = vmatpush1.bf16.msra.mxu1 %v2557_v26  ;;  %1163 = vmatpush1.bf16.msra.mxu0 %v2600_v38  ;;  %v2654_v26 = vld [vmem:[%s3059_s8 + $0x2ec] ss:$16 sps:$4 sm:$0xff]   ;;  %v2687_v30 = vld [vmem:[%s3059_s8 + $0x2a4] ss:$16 sps:$4 sm:$0xff]   ;;  %v2658_v33 = vld [vmem:[%s3059_s8 + $0x308] ss:$16 sps:$4 sm:$0xff]  }
  0x40   : > { %1250 = vmatprep.subr.bf16.mxu1 %v2559_v28  ;;  %1164 = vmatprep.subr.bf16.mxu0 %v2603_v40  ;;  %v2679_v28 = vld [vmem:[%s3059_s8 + $0x280] ss:$16 sps:$4 sm:$0xff]   ;;  %v2660_v31 = vld [vmem:[%s3059_s8 + $0x30c] ss:$16 sps:$4 sm:$0xff]   ;;  %v2693_v34 = vld [vmem:[%s3059_s8 + $0x2c4] ss:$16 sps:$4 sm:$0xff]  }
  0x41   : > { %v2691_v36 = vld [vmem:[%s3059_s8 + $0x2c0] ss:$16 sps:$4 sm:$0xff]   ;;  %v2699_v38 = vld [vmem:[%s3059_s8 + $0x2e4] ss:$16 sps:$4 sm:$0xff]   ;;  %s2940_s21 = smov 64   ;;  %vm2941_vm0 = vmmov 0  }
  0x42   : > { %v2697_v40 = vld [vmem:[%s3059_s8 + $0x2e0] ss:$16 sps:$4 sm:$0xff]   ;;  %vm1423_vm1 = vcmask 130048   ;;  %s2056_s16 = sshll.u32 %s3066_s23, 4  ;;  %s3500_s27 = sand.u32 1, %s2912_s19   ;;  %s3422_s16 = int_to_ptr.vmem [resolvable:$true] %s2056_s16 }
  0x43   : > { %1251 = vmatpush1.bf16.msra.mxu1 %v2563_v29  ;;  %1165 = vmatpush1.bf16.msra.mxu0 %v2606_v42  ;;  %v2652_v29 = vld [vmem:[%s3059_s8 + $0x2e8] ss:$16 sps:$4 sm:$0xff]   ;;  %v2705_v42 = vld [vmem:[%s3059_s8 + $0x304] ss:$16 sps:$4 sm:$0xff]   ;;  %s3432_s7 = scalar_lea.sflag [#allocation3], %s3500_s27 }
  0x44   : > { %1252 = vmatprep.subr.bf16.mxu1 %v2565_v32  ;;  %1166 = vmatprep.subr.bf16.mxu0 %v2613_v44  ;;  %v2685_v32 = vld [vmem:[%s3059_s8 + $0x2a0] ss:$16 sps:$4 sm:$0xff]  }
  0x45   : > { %v2703_v44 = vld [vmem:[%s3059_s8 + $0x300] ss:$16 sps:$4 sm:$0xff]  }
  0x47   : > { %1253 = vmatpush1.bf16.msra.mxu1 %v2569_v35  ;;  %1167 = vmatpush1.bf16.msra.mxu0 %v2615_v46  ;;  %v2666_v35 = vld [vmem:[%s3059_s8 + $0x32c] ss:$16 sps:$4 sm:$0xff]   ;;  %v2711_v46 = vld [vmem:[%s3059_s8 + $0x324] ss:$16 sps:$4 sm:$0xff]  }
  0x48   : > { %1254 = vmatprep.subr.bf16.mxu1 %v2571_v37  ;;  %1168 = vmatprep.subr.bf16.mxu0 %v2619_v48  ;;  %v2664_v37 = vld [vmem:[%s3059_s8 + $0x328] ss:$16 sps:$4 sm:$0xff]   ;;  %v2709_v48 = vld [vmem:[%s3059_s8 + $0x320] ss:$16 sps:$4 sm:$0xff]  }
  0x4b   : > { %1255 = vmatpush1.bf16.msra.mxu1 %v2575_v39  ;;  %1169 = vmatpush1.bf16.msra.mxu0 %v2621_v50  ;;  %v2672_v39 = vld [vmem:[%s3059_s8 + $0x34c] ss:$16 sps:$4 sm:$0xff]   ;;  %v2714_v50 = vld [vmem:[%s3059_s8 + $0x344] ss:$16 sps:$4 sm:$0xff]  }
  0x4c   : > { %1256 = vmatprep.subr.bf16.mxu1 %v2577_v41  ;;  %1170 = vmatprep.subr.bf16.mxu0 %v2625_v52  ;;  %v2670_v41 = vld [vmem:[%s3059_s8 + $0x348] ss:$16 sps:$4 sm:$0xff]   ;;  %v2712_v52 = vld [vmem:[%s3059_s8 + $0x340] ss:$16 sps:$4 sm:$0xff]  }
  0x4f   : > { %1257 = vmatpush1.bf16.msra.mxu1 %v2581_v43  ;;  %1171 = vmatpush1.bf16.msra.mxu0 %v2627_v54  ;;  %v2678_v43 = vld [vmem:[%s3059_s8 + $0x36c] ss:$16 sps:$4 sm:$0xff]   ;;  %v2717_v54 = vld [vmem:[%s3059_s8 + $0x364] ss:$16 sps:$4 sm:$0xff]  }
  0x50   : > { %1258 = vmatprep.subr.bf16.mxu1 %v2583_v45  ;;  %1172 = vmatprep.subr.bf16.mxu0 %v2631_v56  ;;  %v2676_v45 = vld [vmem:[%s3059_s8 + $0x368] ss:$16 sps:$4 sm:$0xff]   ;;  %v2715_v56 = vld [vmem:[%s3059_s8 + $0x360] ss:$16 sps:$4 sm:$0xff]  }
  0x53   : > { %1259 = vmatpush1.bf16.msra.mxu1 %v2587_v47  ;;  %1173 = vmatpush1.bf16.msra.mxu0 %v2633_v58  ;;  %v2684_v47 = vld [vmem:[%s3059_s8 + $0x38c] ss:$16 sps:$4 sm:$0xff]   ;;  %v2720_v58 = vld [vmem:[%s3059_s8 + $0x384] ss:$16 sps:$4 sm:$0xff]  }
  0x54   : > { %1260 = vmatprep.subr.bf16.mxu1 %v2589_v49  ;;  %1174 = vmatprep.subr.bf16.mxu0 %v2637_v60  ;;  %v2682_v49 = vld [vmem:[%s3059_s8 + $0x388] ss:$16 sps:$4 sm:$0xff]   ;;  %v2718_v60 = vld [vmem:[%s3059_s8 + $0x380] ss:$16 sps:$4 sm:$0xff]  }
  0x57   : > { %1261 = vmatpush1.bf16.msra.mxu1 %v2593_v51  ;;  %1175 = vmatpush1.bf16.msra.mxu0 %v2639_v63  ;;  %v2690_v51 = vld [vmem:[%s3059_s8 + $0x3ac] ss:$16 sps:$4 sm:$0xff]   ;;  %v2706_v63 = vld [vmem:[%s3054_s17 + $0x8] ss:$16 sps:$4 sm:$0xff]  }
  0x58   : > { %1262 = vmatprep.subr.bf16.mxu1 %v2595_v53  ;;  %1176 = vmatprep.subr.bf16.mxu0 %v2643_v1  ;;  %v2688_v53 = vld [vmem:[%s3059_s8 + $0x3a8] ss:$16 sps:$4 sm:$0xff]   ;;  %v2726_v1 = vld [vmem:[%s3059_s8 + $0x3c4] ss:$16 sps:$4 sm:$0xff]  }
  0x5b   : > { %1263 = vmatpush1.bf16.msra.mxu1 %v2599_v55  ;;  %1177 = vmatpush1.bf16.msra.mxu0 %v2645_v3  ;;  %v2696_v55 = vld [vmem:[%s3059_s8 + $0x3cc] ss:$16 sps:$4 sm:$0xff]   ;;  %v2729_v3 = vld [vmem:[%s3059_s8 + $0x3e4] ss:$16 sps:$4 sm:$0xff]  }
  0x5c   : > { %1264 = vmatprep.subr.bf16.mxu1 %v2601_v57  ;;  %1178 = vmatprep.subr.bf16.mxu0 %v2649_v5  ;;  %v2694_v57 = vld [vmem:[%s3059_s8 + $0x3c8] ss:$16 sps:$4 sm:$0xff]   ;;  %v2939_v5 = vmov 0.0  }
  0x5f   : > { %1265 = vmatpush1.bf16.msra.mxu1 %v2605_v59  ;;  %1179 = vmatpush1.bf16.msra.mxu0 %v2651_v7  ;;  %v2702_v59 = vld [vmem:[%s3059_s8 + $0x3ec] ss:$16 sps:$4 sm:$0xff]  }
  0x60   : > { %1277 = vmatprep.subr.bf16.mxu1 %v2612_v61  ;;  %1191 = vmatprep.subr.bf16.mxu0 %v2657_v9  ;;  %v2700_v61 = vld [vmem:[%s3059_s8 + $0x3e8] ss:$16 sps:$4 sm:$0xff]  }
  0x62   : > { %1267 = vmatmul.mubr.bf16.vlgmr.msra.gmra.mrb[0].mxu1 %v2607_v62  ;;  %1181 = vmatmul.mubr.bf16.vlgmr.msra.gmra.mrb[0].mxu0 %v2607_v62  ;;  %v2723_v62 = vld [vmem:[%s3059_s8 + $0x3a4] ss:$16 sps:$4 sm:$0xff]  }
  0x63   : > { %1278 = vmatpush1.bf16.msra.mxu1 %v2610_v0  ;;  %1192 = vmatpush1.bf16.msra.mxu0 %v2655_v11  ;;  %v2721_v0 = vld [vmem:[%s3059_s8 + $0x3a0] ss:$16 sps:$4 sm:$0xff]  }
  0x64   : > { %1279 = vmatprep.subr.bf16.mxu1 %v2618_v2  ;;  %1193 = vmatprep.subr.bf16.mxu0 %v2663_v13  ;;  %v2724_v2 = vld [vmem:[%s3059_s8 + $0x3c0] ss:$16 sps:$4 sm:$0xff]  }
  0x65   : > { %1309 = vmatprep.mubr.bf16.mxu1 %v2708_v16  ;;  %1223 = vmatprep.mubr.bf16.mxu0 %v2708_v16  ;;  %v484_v11 = vld [vmem:[%s3487_s3] sm:$0xff] }
  0x67   : > { %1280 = vmatpush1.bf16.msra.mxu1 %v2616_v4  ;;  %1194 = vmatpush1.bf16.msra.mxu0 %v2661_v15  ;;  %v2727_v4 = vld [vmem:[%s3059_s8 + $0x3e0] ss:$16 sps:$4 sm:$0xff]   ;;  %v485_v15 = vld [vmem:[%s3487_s3 + $0x8] sm:$0xff]  ;;  %s2842_s8 = scalar_lea.vmem %s3422_s16, 1024 }
  0x68   : > { %1281 = vmatprep.subr.bf16.mxu1 %v2624_v6  ;;  %1195 = vmatprep.subr.bf16.mxu0 %v2669_v18  ;;  %p2843_p1 = scmp.ne.s32.totalorder %s3422_s16, %s2842_s8 }
  0x6a   : > { %p2844_p2 = pnand %p2843_p1, %p3024_p3 }
  0x6b   : > { %1282 = vmatpush1.bf16.msra.mxu1 %v2622_v8  ;;  %1196 = vmatpush1.bf16.msra.mxu0 %v2667_v20 }
  0x6c   : > { %1283 = vmatprep.subr.bf16.mxu1 %v2630_v10  ;;  %1197 = vmatprep.subr.bf16.mxu0 %v2675_v22  ;;  %p2845_p4 = pneg %p2844_p2 }
  0x6f   : > { %1284 = vmatpush1.bf16.msra.mxu1 %v2628_v12  ;;  %1198 = vmatpush1.bf16.msra.mxu0 %v2673_v25  ;;  %v3247_v25 = vld [vmem:[%s3488_s4 + $0x8] sm:$0xff] }
  0x70   : > { %1285 = vmatprep.subr.bf16.mxu1 %v2636_v14  ;;  %1199 = vmatprep.subr.bf16.mxu0 %v2681_v27 }
  0x73   : > { %1286 = vmatpush1.bf16.msra.mxu1 %v2634_v17  ;;  %1200 = vmatpush1.bf16.msra.mxu0 %v2679_v28 }
  0x74   : > { %1287 = vmatprep.subr.bf16.mxu1 %v2642_v19  ;;  %1201 = vmatprep.subr.bf16.mxu0 %v2687_v30 }
  0x77   : > { %1288 = vmatpush1.bf16.msra.mxu1 %v2640_v21  ;;  %1202 = vmatpush1.bf16.msra.mxu0 %v2685_v32  ;;  %v3241_v21 = vld [vmem:[%s3488_s4] sm:$0xff] }
  0x78   : > { %1289 = vmatprep.subr.bf16.mxu1 %v2648_v23  ;;  %1203 = vmatprep.subr.bf16.mxu0 %v2693_v34 }
  0x7b   : > { %1290 = vmatpush1.bf16.msra.mxu1 %v2646_v24  ;;  %1204 = vmatpush1.bf16.msra.mxu0 %v2691_v36 }
  0x7c   : > { %1291 = vmatprep.subr.bf16.mxu1 %v2654_v26  ;;  %1205 = vmatprep.subr.bf16.mxu0 %v2699_v38 }
  0x7f   : > { %1292 = vmatpush1.bf16.msra.mxu1 %v2652_v29  ;;  %1206 = vmatpush1.bf16.msra.mxu0 %v2697_v40 }
  0x80   : > { %1293 = vmatprep.subr.bf16.mxu1 %v2660_v31  ;;  %1207 = vmatprep.subr.bf16.mxu0 %v2705_v42 }
  0x83   : > { %1294 = vmatpush1.bf16.msra.mxu1 %v2658_v33  ;;  %1208 = vmatpush1.bf16.msra.mxu0 %v2703_v44 }
  0x84   : > { %1295 = vmatprep.subr.bf16.mxu1 %v2666_v35  ;;  %1209 = vmatprep.subr.bf16.mxu0 %v2711_v46 }
  0x87   : > { %1296 = vmatpush1.bf16.msra.mxu1 %v2664_v37  ;;  %1210 = vmatpush1.bf16.msra.mxu0 %v2709_v48 }
  0x88   : > { %1297 = vmatprep.subr.bf16.mxu1 %v2672_v39  ;;  %1211 = vmatprep.subr.bf16.mxu0 %v2714_v50 }
  0x8b   : > { %1298 = vmatpush1.bf16.msra.mxu1 %v2670_v41  ;;  %1212 = vmatpush1.bf16.msra.mxu0 %v2712_v52 }
  0x8c   : > { %1299 = vmatprep.subr.bf16.mxu1 %v2678_v43  ;;  %1213 = vmatprep.subr.bf16.mxu0 %v2717_v54 }
  0x8f   : > { %1300 = vmatpush1.bf16.msra.mxu1 %v2676_v45  ;;  %1214 = vmatpush1.bf16.msra.mxu0 %v2715_v56 }
  0x90   : > { %1301 = vmatprep.subr.bf16.mxu1 %v2684_v47  ;;  %1215 = vmatprep.subr.bf16.mxu0 %v2720_v58 }
  0x93   : > { %1302 = vmatpush1.bf16.msra.mxu1 %v2682_v49  ;;  %1216 = vmatpush1.bf16.msra.mxu0 %v2718_v60 }
  0x94   : > { %1303 = vmatprep.subr.bf16.mxu1 %v2690_v51  ;;  %1217 = vmatprep.subr.bf16.mxu0 %v2723_v62 }
  0x97   : > { %1304 = vmatpush1.bf16.msra.mxu1 %v2688_v53  ;;  %1218 = vmatpush1.bf16.msra.mxu0 %v2721_v0 }
  0x98   : > { %1305 = vmatprep.subr.bf16.mxu1 %v2696_v55  ;;  %1219 = vmatprep.subr.bf16.mxu0 %v2726_v1 }
  0x9b   : > { %1306 = vmatpush1.bf16.msra.mxu1 %v2694_v57  ;;  %1220 = vmatpush1.bf16.msra.mxu0 %v2724_v2 }
  0x9c   : > { %1307 = vmatprep.subr.bf16.mxu1 %v2702_v59  ;;  %1221 = vmatprep.subr.bf16.mxu0 %v2729_v3 }
  0x9f   : > { %1308 = vmatpush1.bf16.msra.mxu1 %v2700_v61  ;;  %1222 = vmatpush1.bf16.msra.mxu0 %v2727_v4 }
  0xa0   : > { %2415 = vmatprep.subr.bf16.mxu1 %v2939_v5  ;;  %2395 = vmatprep.subr.bf16.mxu0 %v2939_v5 }
  0xa2   : > { %1310 = vmatmul.mubr.bf16.vlgmr.msra.gmra.mrb[0].mxu1 %v2706_v63  ;;  %1224 = vmatmul.mubr.bf16.vlgmr.msra.gmra.mrb[0].mxu0 %v2706_v63 }
  0xa3   : > { %2411 = vmatprep.mubr.msk.bf16.mxu0 %vm2941_vm0, %v2939_v5  ;;  %2417 = vmatprep.mubr.msk.bf16.mxu1 %vm2941_vm0, %v2939_v5 }
 0x175   : > { %v1311_v6 = vpop.f32.mrb[0].mxu1  ;;  %v1225_v12 = vpop.f32.mrb[0].mxu0 }
 0x176   : > { %1322 = vrot.lane.b32.xlu0 %v1311_v6, %s2940_s21  ;;  %v1313_v7 = vpop.f32.mrb[1].mxu1  ;;  %v3220_v13 = vmul.f32 %v1225_v12, %v484_v11  ;;  %v3223_v14 = vpop.f32.mrb[1].mxu0  ;;  %v1320_v23 = vmul.f32 %v1311_v6, %v484_v11 }
 0x177   : > { %v1315_v8 = vpop.f32.mrb[2].mxu1  ;;  %v3229_v16 = vmul.f32 %v3223_v14, %v484_v11  ;;  %v1229_v17 = vpop.f32.mrb[2].mxu0 }
 0x178   : > { %v1317_v9 = vpop.f32.mrb[3].mxu1  ;;  %v3231_v18 = vmul.f32 %v1229_v17, %v485_v15  ;;  %v3233_v19 = vpop.f32.mrb[3].mxu0  ;;  %v1321_v28 = vmul.f32 %v1315_v8, %v485_v15 }
 0x179   : > { %v3212_v10 = vpack.c.bf16 %v1317_v9, %v1313_v7  ;;  %v3236_v20 = vmul.f32 %v3233_v19, %v485_v15 }
 0x17a   : > { %1324 = vrot.lane.b32.xlu0 %v1315_v8, %s2940_s21 }
 0x17b   : > { %2416 = vmatpush3.bf16.msra.mxu1 %v3212_v10 }
 0x17c   : > { %2421 = vmatprep.subr.bf16.mxu1 %v2939_v5 }
 0x17e   : > { %1373 = vrot.lane.b32.xlu0 %v1225_v12, %s2940_s21 }
 0x1e8   : > { %v1323_v22 = vpop.permute.xlu0 %1322 }
 0x1e9   : > { %v1326_v24 = vmul.f32 %v1323_v22, %v3241_v21 }
 0x1eb   : > { %v1328_v26 = vadd.f32 %v1326_v24, %v1320_v23 }
 0x1ec   : > { %v1325_v27 = vpop.permute.xlu0 %1324 }
 0x1ed   : > { %v1327_v29 = vmul.f32 %v1325_v27, %v3247_v25  ;;  %1330 = vxpose.xlu1.b32.start [1/2] (short) %v1328_v26, 128 }
 0x1ef   : > { %v1329_v30 = vadd.f32 %v1327_v29, %v1321_v28 }
 0x1f0   : > { %v1374_v55 = vpop.permute.xlu0 %1373 }
 0x1f1   : > { %1331 = vxpose.xlu1.b32.end [2/2] (short) %v1329_v30, 128  ;;  %v1377_v56 = vmul.f32 %v1374_v55, %v3241_v21  ;;  %v2745_v55 = vld [vmem:[%s3064_s10 + $0x48] ss:$16 sps:$4 sm:$0xff]  }
 0x1f3   : > { %v1379_v59 = vadd.f32 %v1377_v56, %v3220_v13  ;;  %v2753_v56 = vld [vmem:[%s3064_s10 + $0x6c] ss:$16 sps:$4 sm:$0xff]  }
 0x247   : > { %1375 = vrot.lane.b32.xlu1 %v1229_v17, %s2940_s21 }
 0x26d   : > { %v1346_v31 = vpop.trf.xlu1 }
 0x271   : > { %v1347_v32 = vpop.trf.xlu1 }
 0x272   : > { %v3255_v33 = vpack.c.bf16 %v1347_v32, %v1346_v31 }
 0x274   : > { %2396 = vmatpush3.bf16.msra.mxu0 %v3255_v33 }
 0x275   : > { %v1348_v34 = vpop.trf.xlu1  ;;  %2397 = vmatprep.subr.bf16.mxu0 %v2939_v5 }
 0x279   : > { %v1349_v35 = vpop.trf.xlu1 }
 0x27a   : > { %v3259_v36 = vpack.c.bf16 %v1349_v35, %v1348_v34 }
 0x27c   : > { %2398 = vmatpush3.bf16.msra.mxu0 %v3259_v36 }
 0x27d   : > { %v1350_v37 = vpop.trf.xlu1  ;;  %2399 = vmatprep.subr.bf16.mxu0 %v2939_v5 }
 0x281   : > { %v1351_v38 = vpop.trf.xlu1 }
 0x282   : > { %v3263_v39 = vpack.c.bf16 %v1351_v38, %v1350_v37 }
 0x284   : > { %2400 = vmatpush3.bf16.msra.mxu0 %v3263_v39 }
 0x285   : > { %v1352_v40 = vpop.trf.xlu1  ;;  %2401 = vmatprep.subr.bf16.mxu0 %v2939_v5 }
 0x289   : > { %v1353_v41 = vpop.trf.xlu1 }
 0x28a   : > { %v3267_v42 = vpack.c.bf16 %v1353_v41, %v1352_v40 }
 0x28c   : > { %2402 = vmatpush3.bf16.msra.mxu0 %v3267_v42 }
 0x28d   : > { %v1354_v43 = vpop.trf.xlu1  ;;  %2403 = vmatprep.subr.bf16.mxu0 %v2939_v5 }
 0x291   : > { %v1355_v44 = vpop.trf.xlu1 }
 0x292   : > { %v3271_v45 = vpack.c.bf16 %v1355_v44, %v1354_v43 }
 0x294   : > { %2404 = vmatpush3.bf16.msra.mxu0 %v3271_v45 }
 0x295   : > { %v1356_v46 = vpop.trf.xlu1  ;;  %2405 = vmatprep.subr.bf16.mxu0 %v2939_v5 }
 0x299   : > { %v1357_v47 = vpop.trf.xlu1 }
 0x29a   : > { %v3275_v48 = vpack.c.bf16 %v1357_v47, %v1356_v46 }
 0x29c   : > { %2406 = vmatpush3.bf16.msra.mxu0 %v3275_v48 }
 0x29d   : > { %v1358_v49 = vpop.trf.xlu1  ;;  %2407 = vmatprep.subr.bf16.mxu0 %v2939_v5 }
 0x2a1   : > { %v1359_v50 = vpop.trf.xlu1 }
 0x2a2   : > { %v3279_v51 = vpack.c.bf16 %v1359_v50, %v1358_v49  ;;  %v2732_v49 = vld [vmem:[%s3064_s10 + $0x4] ss:$16 sps:$4 sm:$0xff]   ;;  %v2733_v50 = vld [vmem:[%s3064_s10 + $0x8] ss:$16 sps:$4 sm:$0xff]  }
 0x2a4   : > { %2408 = vmatpush3.bf16.msra.mxu0 %v3279_v51 }
 0x2a5   : > { %v1360_v52 = vpop.trf.xlu1  ;;  %2409 = vmatprep.subr.bf16.mxu0 %v2939_v5 }
 0x2a9   : > { %v1361_v53 = vpop.trf.xlu1 }
 0x2aa   : > { %v3283_v54 = vpack.c.bf16 %v1361_v53, %v1360_v52  ;;  %v2741_v52 = vld [vmem:[%s3064_s10 + $0x2c] ss:$16 sps:$4 sm:$0xff]   ;;  %v2739_v53 = vld [vmem:[%s3064_s10 + $0x28] ss:$16 sps:$4 sm:$0xff]  }
 0x2ac   : > { %2410 = vmatpush3.bf16.msra.mxu0 %v3283_v54 }
 0x2ad   : > { %2441 = vmatprep.subr.bf16.mxu0 %v2939_v5 }
 0x2b9   : > { %v1376_v57 = vpop.permute.xlu1 %1375 }
 0x2ba   : > { %v1378_v58 = vmul.f32 %v1376_v57, %v3247_v25  ;;  %v2751_v57 = vld [vmem:[%s3064_s10 + $0x68] ss:$16 sps:$4 sm:$0xff]  }
 0x2bc   : > { %v1380_v60 = vadd.f32 %v1378_v58, %v3231_v18  ;;  %v2759_v58 = vld [vmem:[%s3064_s10 + $0x8c] ss:$16 sps:$4 sm:$0xff]  }
 0x2be   : > { %v1381_v61 = vpack.c.bf16 %v1380_v60, %v1379_v59  ;;  %v2757_v59 = vld [vmem:[%s3064_s10 + $0x88] ss:$16 sps:$4 sm:$0xff]   ;;  %v2765_v60 = vld [vmem:[%s3064_s10 + $0xac] ss:$16 sps:$4 sm:$0xff]  }
 0x2c0   : > { %2412 = vmatmul.mubr.bf16.vlgmr.msra.gmra.mrb[4].mxu0 %v1381_v61  ;;  %v2763_v61 = vld [vmem:[%s3064_s10 + $0xa8] ss:$16 sps:$4 sm:$0xff]  }
 0x2c1   : > { %2442 = vmatpush3.bf16.msra.mxu0 %v3212_v10  ;;  %2443 = vmatprep.mubr.msk.bf16.mxu0 %vm2941_vm0, %v2939_v5 }
 0x2c2   : > { %1940 = vmatprep.subr.bf16.mxu0 %v2732_v49  ;;  %v2810_v49 = vld [vmem:[%s3064_s10 + $0x1a4] ss:$16 sps:$4 sm:$0xff]  }
 0x393   : > { %v1416_v62 = vpop.f32.mrb[4].mxu0 }
 0x394   : > { %v2413_v63 = vpop.f32.mrb[5].mxu0  ;;  %v1424_v0 = vsel %vm1423_vm1, %v1416_v62, -inf }
 0x395   : > { %1425 = vmax.xlane.f32.xlu0 %v1424_v0  ;;  %v1419_v1 = vpop.f32.mrb[6].mxu0  ;;  %v2769_v63 = vld [vmem:[%s3064_s10 + $0xc8] ss:$16 sps:$4 sm:$0xff]   ;;  %v2777_v0 = vld [vmem:[%s3064_s10 + $0xec] ss:$16 sps:$4 sm:$0xff]  }
 0x396   : > { %v2414_v2 = vpop.f32.mrb[7].mxu0  ;;  %v1427_v3 = vsel %vm1423_vm1, %v1419_v1, -inf }
 0x397   : > { %v2783_v2 = vld [vmem:[%s3064_s10 + $0x10c] ss:$16 sps:$4 sm:$0xff]  }
 0x399   : > { %1428 = vmax.xlane.f32.xlu0 %v1427_v3  ;;  %v2781_v3 = vld [vmem:[%s3064_s10 + $0x108] ss:$16 sps:$4 sm:$0xff]  }
 0x422   : > { %v1426_v4 = vpop.xlane.xlu0 %1425 }
 0x423   : > { %v1430_v6 = vsub.f32 %v1416_v62, %v1426_v4  ;;  %v2771_v62 = vld [vmem:[%s3064_s10 + $0xcc] ss:$16 sps:$4 sm:$0xff]  }
 0x424   : > { %v2789_v4 = vld [vmem:[%s3064_s10 + $0x12c] ss:$16 sps:$4 sm:$0xff]  }
 0x425   : > { %v1432_v7 = vmul.f32 1.442695, %v1430_v6  ;;  %v2787_v6 = vld [vmem:[%s3064_s10 + $0x128] ss:$16 sps:$4 sm:$0xff]  }
 0x426   : > { %v1429_v8 = vpop.xlane.xlu0 %1428 }
 0x427   : > { %2826 = vpow2.f32 %v1432_v7  ;;  %v1431_v9 = vsub.f32 %v1419_v1, %v1429_v8  ;;  %v2775_v1 = vld [vmem:[%s3064_s10 + $0xe8] ss:$16 sps:$4 sm:$0xff]   ;;  %v2795_v7 = vld [vmem:[%s3064_s10 + $0x14c] ss:$16 sps:$4 sm:$0xff]  }
 0x428   : > { %v2793_v8 = vld [vmem:[%s3064_s10 + $0x148] ss:$16 sps:$4 sm:$0xff]  }
 0x429   : > { %v1434_v10 = vmul.f32 1.442695, %v1431_v9  ;;  %v2801_v9 = vld [vmem:[%s3064_s10 + $0x16c] ss:$16 sps:$4 sm:$0xff]  }
 0x42b   : > { %2828 = vpow2.f32 %v1434_v10  ;;  %v2799_v10 = vld [vmem:[%s3064_s10 + $0x168] ss:$16 sps:$4 sm:$0xff]  }
 0x431   : > { %v2827_v11 = vpop.eup %2826 }
 0x432   : > { %v1436_v12 = vsel %vm1423_vm1, %v2827_v11, 0.0 }
 0x433   : > { %1437 = vadd.xlane.f32.xlu0 %v1436_v12  ;;  %v2805_v12 = vld [vmem:[%s3064_s10 + $0x188] ss:$16 sps:$4 sm:$0xff]  }
 0x435   : > { %v2829_v13 = vpop.eup %2828 }
 0x436   : > { %v1439_v15 = vsel %vm1423_vm1, %v2829_v13, 0.0 }
 0x437   : > { %1440 = vadd.xlane.f32.xlu0 %v1439_v15  ;;  %v2811_v15 = vld [vmem:[%s3064_s10 + $0x1a8] ss:$16 sps:$4 sm:$0xff]  }
 0x44d   : > { %1493 = vrot.lane.b32.xlu0 %v3223_v14, %s2940_s21 }
 0x451   : > { %1495 = vrot.lane.b32.xlu0 %v3233_v19, %s2940_s21  ;;  %s2942_s21 = smov [#allocation2]  }
 0x452   : > { %s2846_s24 = sshll.u32 %s2942_s21, 4  ;;  %s2847_s24 = int_to_ptr.vmem [resolvable:$false] %s2846_s24 }
 0x453   : > { %s2848_s28 = scalar_lea.vmem %s2847_s24, 2048  ;;  %p2849_p5 = scmp.lt.s32.totalorder %s3422_s16, %s2847_s24 }
 0x454   : > { %p2850_p6 = scmp.lt.s32.totalorder %s2848_s28, %s2842_s8 }
 0x456   : > { %p2851_p7 = por %p2850_p6, %p2849_p5 }
 0x458   : > { %p2852_p8 = pnand %p2851_p7, %p2845_p4 }
 0x4c0   : > { %v1438_v17 = vpop.xlane.xlu0 %1437 }
 0x4c1   : > { %2830 = vrcp.f32 %v1438_v17  ;;  %v2819_v17 = vld [vmem:[%s3064_s10 + $0x1cc] ss:$16 sps:$4 sm:$0xff]  }
 0x4c4   : > { %v1441_v18 = vpop.xlane.xlu0 %1440 }
 0x4c5   : > { %2832 = vrcp.f32 %v1441_v18  ;;  %v2817_v18 = vld [vmem:[%s3064_s10 + $0x1c8] ss:$16 sps:$4 sm:$0xff]  }
 0x4c8   : > { %v1494_v22 = vpop.permute.xlu0 %1493 }
 0x4c9   : > { %v1497_v23 = vmul.f32 %v1494_v22, %v3241_v21 }
 0x4cb   : > { %v2831_v26 = vpop.eup %2830  ;;  %v1499_v29 = vadd.f32 %v1497_v23, %v3229_v16 }
 0x4cc   : > { %v1496_v24 = vpop.permute.xlu0 %1495  ;;  %v1444_v14 = vmul.f32 %v2831_v26, %v2827_v11  ;;  %v2807_v11 = vld [vmem:[%s3064_s10 + $0x18c] ss:$16 sps:$4 sm:$0xff]  }
 0x4cd   : > { %v1498_v27 = vmul.f32 %v1496_v24, %v3247_v25 }
 0x4cf   : > { %v2833_v28 = vpop.eup %2832  ;;  %v1500_v30 = vadd.f32 %v1498_v27, %v3236_v20 }
 0x4d0   : > { %v1445_v31 = vmul.f32 %v2833_v28, %v2829_v13  ;;  %v2813_v13 = vld [vmem:[%s3064_s10 + $0x1ac] ss:$16 sps:$4 sm:$0xff]  }
 0x4d1   : > { %v1501_v32 = vpack.c.bf16 %v1500_v30, %v1499_v29  ;;  %v2730_v29 = vld [vmem:[%s3064_s10] ss:$16 sps:$4 sm:$0xff]  }
 0x4d2   : > { %v1446_v19 = vpack.c.bf16 %v1445_v31, %v1444_v14  ;;  %v2738_v14 = vld [vmem:[%s3064_s10 + $0x24] ss:$16 sps:$4 sm:$0xff]   ;;  %v2736_v31 = vld [vmem:[%s3064_s10 + $0x20] ss:$16 sps:$4 sm:$0xff]  }
 0x4d4   : > { %2418 = vmatmul.mubr.msk.bf16.vlgmr.msra.gmra.mrb[4].mxu1 %vm1423_vm1, %v1446_v19  ;;  %v2742_v19 = vld [vmem:[%s3064_s10 + $0x40] ss:$16 sps:$4 sm:$0xff]  }
 0x4d5   : > { %2422 = vmatpush3.bf16.msra.mxu1 %v3255_v33  ;;  %2437 = vmatprep.mubr.msk.bf16.mxu1 %vm2941_vm0, %v2939_v5 }
 0x4d6   : > { %2423 = vmatprep.subr.bf16.mxu1 %v2939_v5 }
 0x4d9   : > { %2424 = vmatpush3.bf16.msra.mxu1 %v3259_v36 }
 0x4da   : > { %2425 = vmatprep.subr.bf16.mxu1 %v2939_v5 }
 0x4dd   : > { %2426 = vmatpush3.bf16.msra.mxu1 %v3263_v39 }
 0x4de   : > { %2427 = vmatprep.subr.bf16.mxu1 %v2939_v5 }
 0x4e1   : > { %2428 = vmatpush3.bf16.msra.mxu1 %v3267_v42 }
 0x4e2   : > { %2429 = vmatprep.subr.bf16.mxu1 %v2939_v5 }
 0x4e5   : > { %2430 = vmatpush3.bf16.msra.mxu1 %v3271_v45 }
 0x4e6   : > { %2431 = vmatprep.subr.bf16.mxu1 %v2939_v5 }
 0x4e9   : > { %2432 = vmatpush3.bf16.msra.mxu1 %v3275_v48 }
 0x4ea   : > { %2433 = vmatprep.subr.bf16.mxu1 %v2939_v5 }
 0x4ed   : > { %2434 = vmatpush3.bf16.msra.mxu1 %v3279_v51  ;;  %v2735_v51 = vld [vmem:[%s3064_s10 + $0xc] ss:$16 sps:$4 sm:$0xff]  }
 0x4ee   : > { %2435 = vmatprep.subr.bf16.mxu1 %v2939_v5 }
 0x4f1   : > { %2436 = vmatpush3.bf16.msra.mxu1 %v3283_v54  ;;  %v2747_v54 = vld [vmem:[%s3064_s10 + $0x4c] ss:$16 sps:$4 sm:$0xff]  }
 0x4f2   : > { %1983 = vmatprep.subr.bf16.mxu1 %v2735_v51  ;;  %v2816_v51 = vld [vmem:[%s3064_s10 + $0x1c4] ss:$16 sps:$4 sm:$0xff]  }
 0x4f4   : > { %2438 = vmatmul.mubr.bf16.vlgmr.msra.gmra.mrb[8].mxu1 %v1501_v32  ;;  %v2744_v32 = vld [vmem:[%s3064_s10 + $0x44] ss:$16 sps:$4 sm:$0xff]  }
 0x4f5   : > { %1984 = vmatpush1.bf16.msra.mxu1 %v2733_v50  ;;  %v2808_v50 = vld [vmem:[%s3064_s10 + $0x1a0] ss:$16 sps:$4 sm:$0xff]  }
 0x4f6   : > { %1985 = vmatprep.subr.bf16.mxu1 %v2741_v52  ;;  %v2814_v52 = vld [vmem:[%s3064_s10 + $0x1c0] ss:$16 sps:$4 sm:$0xff]  }
 0x4f9   : > { %1986 = vmatpush1.bf16.msra.mxu1 %v2739_v53  ;;  %v2822_v53 = vld [vmem:[%s3064_s10 + $0x1e4] ss:$16 sps:$4 sm:$0xff]  }
 0x4fa   : > { %1987 = vmatprep.subr.bf16.mxu1 %v2747_v54  ;;  %v2825_v54 = vld [vmem:[%s3064_s10 + $0x1ec] ss:$16 sps:$4 sm:$0xff]  }
 0x4fd   : > { %1988 = vmatpush1.bf16.msra.mxu1 %v2745_v55  ;;  %v2820_v55 = vld [vmem:[%s3064_s10 + $0x1e0] ss:$16 sps:$4 sm:$0xff]  }
 0x4fe   : > { %1989 = vmatprep.subr.bf16.mxu1 %v2753_v56  ;;  %v2823_v56 = vld [vmem:[%s3064_s10 + $0x1e8] ss:$16 sps:$4 sm:$0xff]  }
 0x501   : > { %1990 = vmatpush1.bf16.msra.mxu1 %v2751_v57 }
 0x502   : > { %1991 = vmatprep.subr.bf16.mxu1 %v2759_v58 }
 0x505   : > { %1992 = vmatpush1.bf16.msra.mxu1 %v2757_v59 }
 0x506   : > { %1993 = vmatprep.subr.bf16.mxu1 %v2765_v60 }
 0x509   : > { %1994 = vmatpush1.bf16.msra.mxu1 %v2763_v61 }
 0x50a   : > { %1995 = vmatprep.subr.bf16.mxu1 %v2771_v62  ;;  %v1612_v62 = vld [vmem:[%s3066_s23] sm:$0xff] }
 0x50d   : > { %1996 = vmatpush1.bf16.msra.mxu1 %v2769_v63  ;;  %v1614_v63 = vld [vmem:[%s3066_s23 + $0x10] sm:$0xff] }
 0x50e   : > { %1997 = vmatprep.subr.bf16.mxu1 %v2777_v0  ;;  %v1613_v0 = vld [vmem:[%s3066_s23 + $0x8] sm:$0xff] }
 0x511   : > { %1998 = vmatpush1.bf16.msra.mxu1 %v2775_v1  ;;  %v1615_v1 = vld [vmem:[%s3066_s23 + $0x18] sm:$0xff] }
 0x512   : > { %1999 = vmatprep.subr.bf16.mxu1 %v2783_v2 }
 0x515   : > { %2000 = vmatpush1.bf16.msra.mxu1 %v2781_v3 }
 0x516   : > { %2001 = vmatprep.subr.bf16.mxu1 %v2789_v4  ;;  %v1616_v4 = vld [vmem:[%s3066_s23 + $0x20] sm:$0xff] }
 0x519   : > { %2002 = vmatpush1.bf16.msra.mxu1 %v2787_v6  ;;  %v1618_v6 = vld [vmem:[%s3066_s23 + $0x30] sm:$0xff] }
 0x51a   : > { %2003 = vmatprep.subr.bf16.mxu1 %v2795_v7 }
 0x51d   : > { %2004 = vmatpush1.bf16.msra.mxu1 %v2793_v8 }
 0x51e   : > { %2005 = vmatprep.subr.bf16.mxu1 %v2801_v9 }
 0x521   : > { %2006 = vmatpush1.bf16.msra.mxu1 %v2799_v10 }
 0x522   : > { %2007 = vmatprep.subr.bf16.mxu1 %v2807_v11  ;;  %v1619_v11 = vld [vmem:[%s3066_s23 + $0x38] sm:$0xff] }
 0x525   : > { %2008 = vmatpush1.bf16.msra.mxu1 %v2805_v12 }
 0x526   : > { %2009 = vmatprep.subr.bf16.mxu1 %v2813_v13 }
 0x529   : > { %2010 = vmatpush1.bf16.msra.mxu1 %v2811_v15 }
 0x52a   : > { %2011 = vmatprep.subr.bf16.mxu1 %v2819_v17 }
 0x52d   : > { %2012 = vmatpush1.bf16.msra.mxu1 %v2817_v18 }
 0x52e   : > { %2013 = vmatprep.subr.bf16.mxu1 %v2825_v54 }
 0x531   : > { %2014 = vmatpush1.bf16.msra.mxu1 %v2823_v56 }
 0x5a7   : > { %v1484_v16 = vpop.f32.mrb[4].mxu1 }
 0x5a8   : > { %v2419_v20 = vpop.f32.mrb[5].mxu1 }
 0x5a9   : > { %v1487_v21 = vpop.f32.mrb[6].mxu1  ;;  %v2748_v20 = vld [vmem:[%s3064_s10 + $0x60] ss:$16 sps:$4 sm:$0xff]  }
 0x5aa   : > { %v3324_v25 = vpack.c.bf16 %v1487_v21, %v1484_v16  ;;  %v2420_v33 = vpop.f32.mrb[7].mxu1  ;;  %v2750_v16 = vld [vmem:[%s3064_s10 + $0x64] ss:$16 sps:$4 sm:$0xff]  }
 0x5ab   : > { %v2756_v21 = vld [vmem:[%s3064_s10 + $0x84] ss:$16 sps:$4 sm:$0xff]   ;;  %v2754_v33 = vld [vmem:[%s3064_s10 + $0x80] ss:$16 sps:$4 sm:$0xff]  }
 0x5c7   : > { %v1536_v34 = vpop.f32.mrb[8].mxu1 }
 0x5c8   : > { %v2439_v35 = vpop.f32.mrb[9].mxu1  ;;  %v1543_v36 = vsel %vm1423_vm1, %v1536_v34, -inf }
 0x5c9   : > { %1544 = vmax.xlane.f32.xlu0 %v1543_v36  ;;  %v1539_v37 = vpop.f32.mrb[10].mxu1  ;;  %v2760_v35 = vld [vmem:[%s3064_s10 + $0xa0] ss:$16 sps:$4 sm:$0xff]   ;;  %v2768_v36 = vld [vmem:[%s3064_s10 + $0xc4] ss:$16 sps:$4 sm:$0xff]  }
 0x5ca   : > { %v2440_v38 = vpop.f32.mrb[11].mxu1  ;;  %v1546_v39 = vsel %vm1423_vm1, %v1539_v37, -inf }
 0x5cb   : > { %1547 = vmax.xlane.f32.xlu1 %v1546_v39  ;;  %v2774_v38 = vld [vmem:[%s3064_s10 + $0xe4] ss:$16 sps:$4 sm:$0xff]   ;;  %v2772_v39 = vld [vmem:[%s3064_s10 + $0xe0] ss:$16 sps:$4 sm:$0xff]  }
 0x656   : > { %v1545_v5 = vpop.xlane.xlu0 %1544 }
 0x657   : > { %v1549_v40 = vsub.f32 %v1536_v34, %v1545_v5  ;;  %v2762_v34 = vld [vmem:[%s3064_s10 + $0xa4] ss:$16 sps:$4 sm:$0xff]  }
 0x658   : > { %v1548_v41 = vpop.xlane.xlu1 %1547  ;;  %v2780_v5 = vld [vmem:[%s3064_s10 + $0x104] ss:$16 sps:$4 sm:$0xff]  }
 0x659   : > { %v1551_v42 = vmul.f32 1.442695, %v1549_v40  ;;  %v1550_v43 = vsub.f32 %v1539_v37, %v1548_v41  ;;  %v2766_v37 = vld [vmem:[%s3064_s10 + $0xc0] ss:$16 sps:$4 sm:$0xff]   ;;  %v2786_v41 = vld [vmem:[%s3064_s10 + $0x124] ss:$16 sps:$4 sm:$0xff]  }
 0x65a   : > { %v2778_v40 = vld [vmem:[%s3064_s10 + $0x100] ss:$16 sps:$4 sm:$0xff]  }
 0x65b   : > { %2834 = vpow2.f32 %v1551_v42  ;;  %v1553_v44 = vmul.f32 1.442695, %v1550_v43  ;;  %v2784_v42 = vld [vmem:[%s3064_s10 + $0x120] ss:$16 sps:$4 sm:$0xff]   ;;  %v2792_v43 = vld [vmem:[%s3064_s10 + $0x144] ss:$16 sps:$4 sm:$0xff]  }
 0x65d   : > { %2836 = vpow2.f32 %v1553_v44  ;;  %v2790_v44 = vld [vmem:[%s3064_s10 + $0x140] ss:$16 sps:$4 sm:$0xff]  }
 0x665   : > { %v3328_v45 = vpop.eup %2834 }
 0x666   : > { %v1555_v46 = vsel %vm1423_vm1, %v3328_v45, 0.0 }
 0x667   : > { %v3332_v47 = vpop.eup %2836  ;;  %1556 = vadd.xlane.f32.xlu0 %v1555_v46  ;;  %v2796_v46 = vld [vmem:[%s3064_s10 + $0x160] ss:$16 sps:$4 sm:$0xff]  }
 0x668   : > { %v1558_v48 = vsel %vm1423_vm1, %v3332_v47, 0.0 }
 0x66b   : > { %1559 = vadd.xlane.f32.xlu0 %v1558_v48  ;;  %v2802_v48 = vld [vmem:[%s3064_s10 + $0x180] ss:$16 sps:$4 sm:$0xff]  }
 0x6f4   : > { %v1557_v22 = vpop.xlane.xlu0 %1556 }
 0x6f5   : > { %2838 = vrcp.f32 %v1557_v22 }
 0x6f8   : > { %v1560_v23 = vpop.xlane.xlu0 %1559 }
 0x6f9   : > { %2840 = vrcp.f32 %v1560_v23 }
 0x6ff   : > { %v2839_v24 = vpop.eup %2838 }
 0x700   : > { %v1563_v27 = vmul.f32 %v2839_v24, %v3328_v45  ;;  %v2798_v45 = vld [vmem:[%s3064_s10 + $0x164] ss:$16 sps:$4 sm:$0xff]  }
 0x703   : > { %v2841_v26 = vpop.eup %2840 }
 0x704   : > { %v1564_v28 = vmul.f32 %v2841_v26, %v3332_v47  ;;  %v2804_v47 = vld [vmem:[%s3064_s10 + $0x184] ss:$16 sps:$4 sm:$0xff]   ;;  %s2372_s10 = sshll.u32 %s2924_s22, 10 }
 0x705   : > { %s3420_s26 = scalar_lea.hbm %s3489_s5, %s2372_s10 }
 0x706   : > { %v1565_v30 = vpack.c.bf16 %v1564_v28, %v1563_v27 }
 0x708   : > { %2444 = vmatmul.mubr.msk.bf16.vlgmr.msra.gmra.mrb[8].mxu0 %vm1423_vm1, %v1565_v30 }
 0x709   : > { %1941 = vmatpush1.bf16.msra.mxu0 %v2730_v29 }
 0x70a   : > { %1942 = vmatprep.subr.bf16.mxu0 %v2738_v14 }
 0x70d   : > { %1943 = vmatpush1.bf16.msra.mxu0 %v2736_v31 }
 0x70e   : > { %1944 = vmatprep.subr.bf16.mxu0 %v2744_v32 }
 0x711   : > { %1945 = vmatpush1.bf16.msra.mxu0 %v2742_v19 }
 0x712   : > { %1946 = vmatprep.subr.bf16.mxu0 %v2750_v16 }
 0x715   : > { %1947 = vmatpush1.bf16.msra.mxu0 %v2748_v20 }
 0x716   : > { %1948 = vmatprep.subr.bf16.mxu0 %v2756_v21 }
 0x719   : > { %1949 = vmatpush1.bf16.msra.mxu0 %v2754_v33 }
 0x71a   : > { %1950 = vmatprep.subr.bf16.mxu0 %v2762_v34 }
 0x71d   : > { %1951 = vmatpush1.bf16.msra.mxu0 %v2760_v35 }
 0x71e   : > { %1952 = vmatprep.subr.bf16.mxu0 %v2768_v36 }
 0x721   : > { %1953 = vmatpush1.bf16.msra.mxu0 %v2766_v37 }
 0x722   : > { %1954 = vmatprep.subr.bf16.mxu0 %v2774_v38 }
 0x725   : > { %1955 = vmatpush1.bf16.msra.mxu0 %v2772_v39 }
 0x726   : > { %1956 = vmatprep.subr.bf16.mxu0 %v2780_v5 }
 0x729   : > { %1957 = vmatpush1.bf16.msra.mxu0 %v2778_v40 }
 0x72a   : > { %1958 = vmatprep.subr.bf16.mxu0 %v2786_v41 }
 0x72d   : > { %1959 = vmatpush1.bf16.msra.mxu0 %v2784_v42 }
 0x72e   : > { %1960 = vmatprep.subr.bf16.mxu0 %v2792_v43 }
 0x731   : > { %1961 = vmatpush1.bf16.msra.mxu0 %v2790_v44 }
 0x732   : > { %1962 = vmatprep.subr.bf16.mxu0 %v2798_v45 }
 0x735   : > { %1963 = vmatpush1.bf16.msra.mxu0 %v2796_v46 }
 0x736   : > { %1964 = vmatprep.subr.bf16.mxu0 %v2804_v47 }
 0x739   : > { %1965 = vmatpush1.bf16.msra.mxu0 %v2802_v48 }
 0x73a   : > { %1966 = vmatprep.subr.bf16.mxu0 %v2810_v49 }
 0x73d   : > { %1967 = vmatpush1.bf16.msra.mxu0 %v2808_v50 }
 0x73e   : > { %1968 = vmatprep.subr.bf16.mxu0 %v2816_v51 }
 0x741   : > { %1969 = vmatpush1.bf16.msra.mxu0 %v2814_v52 }
 0x742   : > { %1970 = vmatprep.subr.bf16.mxu0 %v2822_v53 }
 0x745   : > { %1971 = vmatpush1.bf16.msra.mxu0 %v2820_v55 }
 0x7db   : > { %v1603_v57 = vpop.f32.mrb[8].mxu0 }
 0x7dc   : > { %v2445_v58 = vpop.f32.mrb[9].mxu0 }
 0x7dd   : > { %v1606_v59 = vpop.f32.mrb[10].mxu0 }
 0x7de   : > { %v1611_v60 = vpack.c.bf16 %v1606_v59, %v1603_v57  ;;  %v2446_v61 = vpop.f32.mrb[11].mxu0 }
 0x7e0   : > { %1972 = vmatprep.mubr.bf16.mxu0 %v1611_v60  ;;  %2015 = vmatprep.mubr.bf16.mxu1 %v1611_v60 }
 0x7e1   : > { %1973 = vmatmul.mubr.bf16.vlgmr.msra.gmra.mrb[12].mxu0 %v3324_v25  ;;  %2016 = vmatmul.mubr.bf16.vlgmr.msra.gmra.mrb[12].mxu1 %v3324_v25  ;;  %v1617_v25 = vld [vmem:[%s3066_s23 + $0x28] sm:$0xff] }
 0x8b4   : > { %v1974_v2 = vpop.f32.mrb[12].mxu0  ;;  %v2017_v3 = vpop.f32.mrb[12].mxu1 }
 0x8b5   : > { %v2026_v7 = vadd.f32 %v1974_v2, %v1612_v62  ;;  %v2028_v8 = vadd.f32 %v2017_v3, %v1614_v63  ;;  %v1976_v9 = vpop.f32.mrb[13].mxu0  ;;  %v2019_v10 = vpop.f32.mrb[13].mxu1 }
 0x8b6   : > { %v2027_v12 = vadd.f32 %v1976_v9, %v1613_v0  ;;  %v2029_v13 = vadd.f32 %v2019_v10, %v1615_v1  ;;  %v1978_v15 = vpop.f32.mrb[14].mxu0  ;;  %v2021_v17 = vpop.f32.mrb[14].mxu1 }
 0x8b7   : > { %2034 = vst [vmem:[%s3066_s23] sm:$0xff] %v2026_v7  ;;  %2036 = vst [vmem:[%s3066_s23 + $0x10] sm:$0xff] %v2028_v8  ;;  %v2030_v18 = vadd.f32 %v1978_v15, %v1616_v4  ;;  %v2032_v22 = vadd.f32 %v2021_v17, %v1618_v6  ;;  %v1980_v23 = vpop.f32.mrb[15].mxu0  ;;  %v2023_v24 = vpop.f32.mrb[15].mxu1 }
 0x8b8   : > { %2035 = vst [vmem:[%s3066_s23 + $0x8] sm:$0xff] %v2027_v12  ;;  %2037 = vst [vmem:[%s3066_s23 + $0x18] sm:$0xff] %v2029_v13  ;;  %v2031_v26 = vadd.f32 %v1980_v23, %v1617_v25  ;;  %v2033_v27 = vadd.f32 %v2023_v24, %v1619_v11 }
 0x8b9   : > { %2038 = vst [vmem:[%s3066_s23 + $0x20] sm:$0xff] %v2030_v18  ;;  %2040 = vst [vmem:[%s3066_s23 + $0x30] sm:$0xff] %v2032_v22 }
 0x8ba   : > { %2039 = vst [vmem:[%s3066_s23 + $0x28] sm:$0xff] %v2031_v26  ;;  %2041 = vst [vmem:[%s3066_s23 + $0x38] sm:$0xff] %v2033_v27 }
 0x8bb   : > { %2855 = shalt.err (!%p2852_p8)
}
 0x8bc   : > { %s2856_s23 = scalar_lea.hbm %s3420_s26, 1024  ;;  %s2860_s12 = scalar_lea.hbm %s3489_s5, 2048 }
 0x8bd   : > { %p2857_p10 = scmp.ne.s32.totalorder %s3420_s26, %s2856_s23  ;;  %p2861_p13 = scmp.lt.u32.totalorder %s3420_s26, %s3489_s5 }
 0x8be   : > { %p2862_p0 = scmp.lt.u32.totalorder %s2860_s12, %s2856_s23  ;;  %p2864_p2 = scmp.lt.u32.totalorder %s2856_s23, %s3420_s26 }
 0x8bf   : > { %p2858_p11 = pnand %p2857_p10, %p3024_p3 }
 0x8c0   : > { %p2863_p1 = por %p2862_p0, %p2861_p13 }
 0x8c1   : > { %p2859_p12 = pneg %p2858_p11 }
 0x8c2   : > { %p2865_p4 = por %p2864_p2, %p2863_p1 }
 0x8c4   : > { %p2866_p5 = pnand %p2865_p4, %p2859_p12 }
 0x8c6   : > { %2869 = shalt.err (!%p2866_p5)
}
 0x8c7   : > { %s2943_s15 = smov 512   ;;  %s2944_s10 = smov 32  }
 0x8c8   : > { %2455 = dma.vmem_to_hbm [thread:$0]  (%p3024_p3), %s3422_s16, 1024, %s3420_s26, %s3432_s7, %s2943_s15, %s2943_s15, %s2944_s10  }
 0x8c9 PF: > { %p2461_p6 = scmp.ge.s32.totalorder %s2936_s25, 2  ;;  %s2071_s22 = sand.u32 1, %s2908_s18  }
 0x8ca   : > { %s2072_s17 = scalar_lea.sflag [#allocation3], %s2071_s22 }
 0x8cb   : > { %p2458_p7 = pnand %p2461_p6, %p3034_p9 }
 0x8cd   : > { %2903 = dma.done.wait (!%p2458_p7), %s2072_s17, 1024  }
 0x8ce   : > { %2905 = vsyncadd (!%p2458_p7), %s2072_s17, 4294966272  ;;  %s18_s25 = sadd.s32 1, %s2936_s25   ;;  %s3501_s21 = sld [smem:[#allocation5_spill]] }
 0x8cf   : > { %p15_p8 = scmp.ge.s32.totalorder %s18_s25, 6   ;;  %s3502_s22 = sld [smem:[#allocation6_spill]] }
 0x8d0   : > { %s3503_s23 = sld [smem:[#allocation7_spill]]  ;;  %s3504_s24 = sld [smem:[#allocation8_spill]] }
 0x8d1   : > { %s3505_s18 = smov %s2912_s19  ;;  %s3506_s19 = smov %s2916_s20 }
 0x8d2   : > { %s3507_s20 = smov %s3042_s9  ;;  %17 = sbr.rel (!%p15_p8) target bundleno = 5 (0x5), region = 85 }
 0x8d9   :  { %2077 = vsyncpa [#allocation3], 1 }
 0x8da   :  { %2079 = vsyncpa [#allocation3 + $0x1], 1 }

</bundles_post_ra>
